<compile_context>
chip_gen: v7x
topology: tpu7x:2x2x1
jax: 0.10.0
libtpu: 0.0.40
codegen_flags: <defaults>
</compile_context>

<pallas_src>
import functools

import jax
import jax.numpy as jnp
from jax import lax
from jax.experimental import pallas as pl
from jax.experimental.pallas import tpu as pltpu  # noqa: F401  (TPU backend)


# --------------------------------------------------------------------------
# Fully fused ESIM kernel.
# --------------------------------------------------------------------------
def _esim_kernel(x_ref, ewih_ref, ewhh_ref, eb_ref,
                 cwih_ref, cwhh_ref, cb_ref,
                 w1_ref, b1_ref, w2_ref, b2_ref,
                 out_ref, *, T, S, B, H, n_classes):
    N = 2 * S                 # recurrence batch: fwd rows [0,S), bwd rows [S,2S)
    G4 = 4 * H                # per-direction gate width (i, f, g, o)
    TS = T * S

    # Live-half mask for the packed hidden state (fwd rows use lanes [0,H),
    # bwd rows use lanes [H,2H)).  Hoisted once, reused by both LSTM stages.
    prow = lax.broadcasted_iota(jnp.int32, (N, 2 * H), 0)
    pcol = lax.broadcasted_iota(jnp.int32, (N, 2 * H), 1)
    pack_mask = ((prow < S) == (pcol < H)).astype(jnp.float32)        # (N, 2H)

    def bilstm(x_flat, wih, whh, bias):
        """x_flat: (T*S, IN) f32, t-major.  Returns list of per-step (N, H) h."""
        # One input-projection matmul for all timesteps of both directions.
        gx = jnp.dot(x_flat.astype(jnp.bfloat16), wih,
                     preferred_element_type=jnp.float32) + bias        # (T*S, 8H)
        # Step-t gate inputs: fwd rows read time t, bwd rows read time T-1-t.
        # Both row blocks are contiguous; the fwd/bwd column halves are
        # 128-lane aligned (G4 = 128).
        gins = [jnp.concatenate(
                    [gx[t * S:(t + 1) * S, :G4],
                     gx[(T - 1 - t) * S:(T - t) * S, G4:]], axis=0)
                for t in range(T)]                                     # (N, 4H)
        hs = []
        c = None
        h2 = None                     # packed (N, 2H) bf16 hidden state
        # Static unroll (T is a small compile-time constant) keeps every index
        # static.  TODO(synk): W_hh could additionally be latched in the MXU
        # across steps via pltpu.matmul_push_rhs/_acc_lhs/_pop; left to Mosaic.
        for t in range(T):
            if t == 0:
                gates = gins[0]                       # h = c = 0 at step 0
            else:
                gates = gins[t] + jnp.dot(h2, whh,
                                          preferred_element_type=jnp.float32)
            sg = jax.nn.sigmoid(gates)                # one EUP tile per step
            g = 2.0 * sg[:, 2 * H:3 * H] - 1.0        # tanh(g) = 2*sig(2g) - 1
            if t == 0:
                c = sg[:, :H] * g
            else:
                c = sg[:, H:2 * H] * c + sg[:, :H] * g
            h = sg[:, 3 * H:] * jnp.tanh(c)
            hs.append(h)
            # Re-pack h for the halved recurrent dot: (N, 2H), dead half zeroed.
            h2 = (jnp.concatenate([h, h], axis=-1)
                  * pack_mask).astype(jnp.bfloat16)
        return hs

    # ---------------- stage 1: input-encoding biLSTM -----------------------
    hs1 = bilstm(x_ref[...], ewih_ref[...], ewhh_ref[...], eb_ref[...])
    # t-major (T*S, 2H) bidirectional output (bwd half un-time-reversed):
    # row t*S + s = [h_fwd[t, s] | h_bwd[t, s]]  (PyTorch bi-LSTM layout).
    enc = jnp.concatenate(
        [jnp.concatenate([hs1[t][:S], hs1[T - 1 - t][S:]], axis=-1)
         for t in range(T)], axis=0)                                   # (TS, 2H)

    # ---------------- stage 2: cross-attention + [x, x~, x-x~, x*x~] -------
    xb = enc.astype(jnp.bfloat16)
    # One matmul gives every pairwise dot product; the partner-sentence /
    # same-batch mask then realizes softmax(E, dim=2) for a-rows and
    # softmax(E, dim=1)^T for b-rows simultaneously.
    e_all = lax.dot_general(xb, xb, (((1,), (1,)), ((), ())),
                            preferred_element_type=jnp.float32)        # (TS, TS)
    r_i = lax.broadcasted_iota(jnp.int32, (TS, TS), 0)
    c_i = lax.broadcasted_iota(jnp.int32, (TS, TS), 1)
    pmask = ((r_i % S + B) % S) == (c_i % S)     # other sentence, same batch
    z = jnp.where(pmask, e_all, -1e30)
    z = z - jnp.max(z, axis=-1, keepdims=True)
    p = jnp.where(pmask, jnp.exp(z), 0.0)
    p = p / jnp.sum(p, axis=-1, keepdims=True)   # exact division (accuracy)
    tilde = jnp.dot(p.astype(jnp.bfloat16), xb,
                    preferred_element_type=jnp.float32)                # (TS, 2H)
    m_all = jnp.concatenate([enc, tilde, enc - tilde, enc * tilde],
                            axis=-1)                                   # (TS, 8H)

    # ---------------- stage 3: composition biLSTM + pooling ----------------
    hs2 = bilstm(m_all, cwih_ref[...], cwhh_ref[...], cb_ref[...])
    # avg/max pooling over time is order-independent -> reduce the raw step
    # tiles directly; no output re-assembly is needed for this stage.
    hsum = hs2[0]
    hmax = hs2[0]
    for t in range(1, T):
        hsum = hsum + hs2[t]
        hmax = jnp.maximum(hmax, hs2[t])
    havg = hsum * (1.0 / T)
    # v = [avg(v_a) | max(v_a) | avg(v_b) | max(v_b)], each block = [fwd | bwd]
    va_avg = jnp.concatenate([havg[:B], havg[S:S + B]], axis=-1)
    va_max = jnp.concatenate([hmax[:B], hmax[S:S + B]], axis=-1)
    vb_avg = jnp.concatenate([havg[B:S], havg[S + B:]], axis=-1)
    vb_max = jnp.concatenate([hmax[B:S], hmax[S + B:]], axis=-1)
    vcat = jnp.concatenate([va_avg, va_max, vb_avg, vb_max], axis=-1)  # (B, 8H)

    # ---------------- stage 4: MLP head -------------------------------------
    # TODO(synk): Dropout = identity; eval-mode BatchNorm1d layers are folded
    # into (w1, b1) / (w2, b2) on the host.
    h1 = jnp.tanh(jnp.dot(vcat.astype(jnp.bfloat16), w1_ref[...],
                          preferred_element_type=jnp.float32) + b1_ref[...])
    logits = jnp.dot(h1.astype(jnp.bfloat16), w2_ref[...],
                     preferred_element_type=jnp.float32) + b2_ref[...]
    # Softmax over the real classes only; padded lanes are masked out.
    valid = lax.broadcasted_iota(jnp.int32, logits.shape, 1) < n_classes
    zl = jnp.where(valid, logits, -1e30)
    zl = zl - jnp.max(zl, axis=-1, keepdims=True)
    ez = jnp.where(valid, jnp.exp(zl), 0.0)
    out_ref[...] = ez / jnp.sum(ez, axis=-1, keepdims=True)


# --------------------------------------------------------------------------
# Full ESIM forward (embedding gather / chunk / t-major layout is JAX glue).
# --------------------------------------------------------------------------
def esim_forward(params, x_ids, hidden, type_num):
    B = x_ids.shape[0]
    ids = x_ids.reshape(B, -1)                           # torch.flatten(x, 1, -1)
    emb = jnp.take(params["embedding"], ids, axis=0)     # (B, 2T, vec)
    T = emb.shape[1] // 2
    vec = emb.shape[2]
    S = 2 * B
    # torch.chunk(x, 2, dim=1): both sentences share the LSTMs -> stack along
    # batch, then go t-major so every per-step gate tile is a contiguous slice.
    x_sab = jnp.concatenate([emb[:, :T, :], emb[:, T:, :]], axis=0)    # (S, T, vec)
    x_flat = jnp.transpose(x_sab, (1, 0, 2)).reshape(T * S, vec)       # (T*S, vec)

    cp = params["w1"].shape[1]
    kern = functools.partial(_esim_kernel, T=T, S=S, B=B, H=hidden,
                             n_classes=type_num)
    out = pl.pallas_call(
        kern,
        out_shape=jax.ShapeDtypeStruct((B, cp), jnp.float32),
    )(x_flat,
      params["enc"]["wih"], params["enc"]["whh"], params["enc"]["b"],
      params["comp"]["wih"], params["comp"]["whh"], params["comp"]["b"],
      params["w1"], params["b1"], params["w2"], params["b2"])
    return out[:, :type_num]


# --------------------------------------------------------------------------
# Deterministic parameter construction (host-side packing / folding).
# --------------------------------------------------------------------------
def make_params(key, vocab, vec, hidden, type_num, cp=128):
    ks = jax.random.split(key, 10)
    H = hidden

    def nrm(k, shape, scale=0.1):
        return (scale * jax.random.normal(k, shape)).astype(jnp.float32)

    def lstm_pack(k, in_dim):
        kw = jax.random.split(k, 6)
        wih_f = nrm(kw[0], (in_dim, 4 * H))
        wih_b = nrm(kw[1], (in_dim, 4 * H))
        whh_f = nrm(kw[2], (H, 4 * H))
        whh_b = nrm(kw[3], (H, 4 * H))
        b_f = nrm(kw[4], (1, 4 * H))          # b_ih + b_hh folded, fwd
        b_b = nrm(kw[5], (1, 4 * H))          # b_ih + b_hh folded, bwd
        # Pre-scale the g-gate (tanh) columns by 2 so the kernel can derive
        # tanh(g) = 2*sigmoid(2g) - 1 from the sigmoid tile (one fewer
        # transcendental per recurrence step).
        gscale = jnp.concatenate(
            [jnp.ones((1, 2 * H)), jnp.full((1, H), 2.0), jnp.ones((1, H))],
            axis=1)
        wih = jnp.concatenate([wih_f * gscale, wih_b * gscale], axis=1)  # (in, 8H)
        whh = jnp.concatenate([whh_f * gscale, whh_b * gscale], axis=0)  # (2H, 4H)
        b = jnp.concatenate([b_f * gscale, b_b * gscale], axis=1)        # (1, 8H)
        return {"wih": wih.astype(jnp.bfloat16),
                "whh": whh.astype(jnp.bfloat16),
                "b": b.astype(jnp.float32)}

    def fold_bn_linear(gamma, beta, mean, var, w, b, eps=1e-5):
        # eval-mode BatchNorm followed by Linear == Linear with rescaled rows.
        scale = gamma / jnp.sqrt(var + eps)
        shift = beta - mean * scale
        return w * scale[:, None], b + shift @ w

    # Fresh (untrained) BatchNorm1d statistics: gamma=1, beta=0, mean=0, var=1.
    f1 = 8 * H
    w1_raw = nrm(ks[3], (f1, type_num))
    b1_raw = nrm(ks[4], (type_num,), 0.05)
    w2_raw = nrm(ks[5], (type_num, type_num))
    b2_raw = nrm(ks[6], (type_num,), 0.05)
    w1_eff, b1_eff = fold_bn_linear(jnp.ones((f1,)), jnp.zeros((f1,)),
                                    jnp.zeros((f1,)), jnp.ones((f1,)),
                                    w1_raw, b1_raw)
    w2_eff, b2_eff = fold_bn_linear(jnp.ones((type_num,)), jnp.zeros((type_num,)),
                                    jnp.zeros((type_num,)), jnp.ones((type_num,)),
                                    w2_raw, b2_raw)

    # Classifier lanes padded to cp=128 (padded lanes are exact zeros and get
    # masked out of the final softmax inside the kernel).
    w1 = jnp.zeros((f1, cp), jnp.float32).at[:, :type_num].set(w1_eff)
    b1 = jnp.zeros((1, cp), jnp.float32).at[0, :type_num].set(b1_eff)
    w2 = jnp.zeros((cp, cp), jnp.float32).at[:type_num, :type_num].set(w2_eff)
    b2 = jnp.zeros((1, cp), jnp.float32).at[0, :type_num].set(b2_eff)

    params = {
        "embedding": nrm(ks[0], (vocab, vec), 1.0),
        "enc": lstm_pack(ks[1], vec),
        "comp": lstm_pack(ks[2], 8 * H),
        "w1": w1.astype(jnp.bfloat16), "b1": b1,
        "w2": w2.astype(jnp.bfloat16), "b2": b2,
    }
    return params, ks[7]


if __name__ == "__main__":
    vocab, vec = 50, 32          # words_dict: (vocab, vector_size)
    hidden = 32                  # lstm_hidden_size
    type_num = 4
    B, word_num = 2, 8           # word_num == per-sentence sequence length

    params, kx = make_params(jax.random.PRNGKey(0), vocab, vec, hidden, type_num)
    # token-id input; flatten(1,-1) gives (B, 2*word_num), chunked into 2 sentences
    x_ids = jax.random.randint(kx, (B, 2, word_num), 0, vocab, dtype=jnp.int32)

    fwd = jax.jit(functools.partial(esim_forward, hidden=hidden,
                                    type_num=type_num))
    out = jax.block_until_ready(fwd(params, x_ids))
    assert out.shape == (B, type_num)
    assert bool(jnp.all(jnp.isfinite(out)))
    print("KERNEL_OK")
</pallas_src>

<mosaic_0001>
module attributes {stable_mosaic.version = 11 : i64} {
  func.func @_esim_kernel(%arg0: memref<32x32xf32, #tpu.memory_space<vmem>>, %arg1: memref<32x256xbf16, #tpu.memory_space<vmem>>, %arg2: memref<64x128xbf16, #tpu.memory_space<vmem>>, %arg3: memref<1x256xf32, #tpu.memory_space<vmem>>, %arg4: memref<256x256xbf16, #tpu.memory_space<vmem>>, %arg5: memref<64x128xbf16, #tpu.memory_space<vmem>>, %arg6: memref<1x256xf32, #tpu.memory_space<vmem>>, %arg7: memref<256x128xbf16, #tpu.memory_space<vmem>>, %arg8: memref<1x128xf32, #tpu.memory_space<vmem>>, %arg9: memref<128x128xbf16, #tpu.memory_space<vmem>>, %arg10: memref<1x128xf32, #tpu.memory_space<vmem>>, %arg11: memref<2x128xf32, #tpu.memory_space<vmem>>) attributes {dimension_semantics = [], scalar_prefetch = 0 : i64, scratch_operands = 0 : i64, tpu.core_type = #tpu.core_type<tc>} {
    %0 = tpu.iota {dimensions = array<i32: 0>} : vector<8x64xi32>
    %1 = tpu.iota {dimensions = array<i32: 1>} : vector<8x64xi32>
    %c4_i32 = arith.constant 4 : i32
    %2 = vector.broadcast %c4_i32 : i32 to vector<8x64xi32>
    %3 = arith.cmpi slt, %0, %2 : vector<8x64xi32>
    %c32_i32 = arith.constant 32 : i32
    %4 = vector.broadcast %c32_i32 : i32 to vector<8x64xi32>
    %5 = arith.cmpi slt, %1, %4 : vector<8x64xi32>
    %6 = arith.xori %3, %5 : vector<8x64xi1>
    %cst = arith.constant dense<true> : vector<8x64xi1>
    %7 = arith.xori %6, %cst : vector<8x64xi1>
    %8 = arith.extui %7 : vector<8x64xi1> to vector<8x64xi32>
    %9 = arith.sitofp %8 : vector<8x64xi32> to vector<8x64xf32>
    %c0 = arith.constant 0 : index
    %c0_0 = arith.constant 0 : index
    %10 = vector.load %arg0[%c0, %c0_0] : memref<32x32xf32, #tpu.memory_space<vmem>>, vector<32x32xf32>
    %c0_1 = arith.constant 0 : index
    %c0_2 = arith.constant 0 : index
    %11 = vector.load %arg1[%c0_1, %c0_2] : memref<32x256xbf16, #tpu.memory_space<vmem>>, vector<32x256xbf16>
    %c0_3 = arith.constant 0 : index
    %c0_4 = arith.constant 0 : index
    %12 = vector.load %arg2[%c0_3, %c0_4] : memref<64x128xbf16, #tpu.memory_space<vmem>>, vector<64x128xbf16>
    %c0_5 = arith.constant 0 : index
    %c0_6 = arith.constant 0 : index
    %13 = vector.load %arg3[%c0_5, %c0_6] : memref<1x256xf32, #tpu.memory_space<vmem>>, vector<1x256xf32>
    %14 = arith.truncf %10 : vector<32x32xf32> to vector<32x32xbf16>
    %cst_7 = arith.constant dense<0.000000e+00> : vector<32x256xf32>
    %15 = tpu.matmul %14, %11, %cst_7 {dimension_numbers = #tpu.dot_dimension_numbers<[1], [0], [0], [1], [0, 0, 1, 1], [], []>} : vector<32x32xbf16>, vector<32x256xbf16>, vector<32x256xf32> -> vector<32x256xf32>
    %16 = vector.broadcast %13 : vector<1x256xf32> to vector<32x256xf32>
    %17 = arith.addf %15, %16 : vector<32x256xf32>
    %18 = vector.extract_strided_slice %17 {offsets = [0, 0], sizes = [4, 128], strides = [1, 1]} : vector<32x256xf32> to vector<4x128xf32>
    %19 = vector.extract_strided_slice %17 {offsets = [28, 128], sizes = [4, 128], strides = [1, 1]} : vector<32x256xf32> to vector<4x128xf32>
    %20 = tpu.concatenate %18, %19 in 0 : vector<4x128xf32>, vector<4x128xf32> -> vector<8x128xf32>
    %21 = vector.extract_strided_slice %17 {offsets = [4, 0], sizes = [4, 128], strides = [1, 1]} : vector<32x256xf32> to vector<4x128xf32>
    %22 = vector.extract_strided_slice %17 {offsets = [24, 128], sizes = [4, 128], strides = [1, 1]} : vector<32x256xf32> to vector<4x128xf32>
    %23 = tpu.concatenate %21, %22 in 0 : vector<4x128xf32>, vector<4x128xf32> -> vector<8x128xf32>
    %24 = vector.extract_strided_slice %17 {offsets = [8, 0], sizes = [4, 128], strides = [1, 1]} : vector<32x256xf32> to vector<4x128xf32>
    %25 = vector.extract_strided_slice %17 {offsets = [20, 128], sizes = [4, 128], strides = [1, 1]} : vector<32x256xf32> to vector<4x128xf32>
    %26 = tpu.concatenate %24, %25 in 0 : vector<4x128xf32>, vector<4x128xf32> -> vector<8x128xf32>
    %27 = vector.extract_strided_slice %17 {offsets = [12, 0], sizes = [4, 128], strides = [1, 1]} : vector<32x256xf32> to vector<4x128xf32>
    %28 = vector.extract_strided_slice %17 {offsets = [16, 128], sizes = [4, 128], strides = [1, 1]} : vector<32x256xf32> to vector<4x128xf32>
    %29 = tpu.concatenate %27, %28 in 0 : vector<4x128xf32>, vector<4x128xf32> -> vector<8x128xf32>
    %30 = vector.extract_strided_slice %17 {offsets = [16, 0], sizes = [4, 128], strides = [1, 1]} : vector<32x256xf32> to vector<4x128xf32>
    %31 = vector.extract_strided_slice %17 {offsets = [12, 128], sizes = [4, 128], strides = [1, 1]} : vector<32x256xf32> to vector<4x128xf32>
    %32 = tpu.concatenate %30, %31 in 0 : vector<4x128xf32>, vector<4x128xf32> -> vector<8x128xf32>
    %33 = vector.extract_strided_slice %17 {offsets = [20, 0], sizes = [4, 128], strides = [1, 1]} : vector<32x256xf32> to vector<4x128xf32>
    %34 = vector.extract_strided_slice %17 {offsets = [8, 128], sizes = [4, 128], strides = [1, 1]} : vector<32x256xf32> to vector<4x128xf32>
    %35 = tpu.concatenate %33, %34 in 0 : vector<4x128xf32>, vector<4x128xf32> -> vector<8x128xf32>
    %36 = vector.extract_strided_slice %17 {offsets = [24, 0], sizes = [4, 128], strides = [1, 1]} : vector<32x256xf32> to vector<4x128xf32>
    %37 = vector.extract_strided_slice %17 {offsets = [4, 128], sizes = [4, 128], strides = [1, 1]} : vector<32x256xf32> to vector<4x128xf32>
    %38 = tpu.concatenate %36, %37 in 0 : vector<4x128xf32>, vector<4x128xf32> -> vector<8x128xf32>
    %39 = vector.extract_strided_slice %17 {offsets = [28, 0], sizes = [4, 128], strides = [1, 1]} : vector<32x256xf32> to vector<4x128xf32>
    %40 = vector.extract_strided_slice %17 {offsets = [0, 128], sizes = [4, 128], strides = [1, 1]} : vector<32x256xf32> to vector<4x128xf32>
    %41 = tpu.concatenate %39, %40 in 0 : vector<4x128xf32>, vector<4x128xf32> -> vector<8x128xf32>
    %42 = arith.negf %20 : vector<8x128xf32>
    %43 = math.exp %42 : vector<8x128xf32>
    %cst_8 = arith.constant 1.000000e+00 : f32
    %44 = vector.broadcast %cst_8 : f32 to vector<8x128xf32>
    %45 = arith.addf %44, %43 : vector<8x128xf32>
    %46 = arith.divf %44, %45 : vector<8x128xf32>
    %47 = vector.extract_strided_slice %46 {offsets = [0, 64], sizes = [8, 32], strides = [1, 1]} : vector<8x128xf32> to vector<8x32xf32>
    %cst_9 = arith.constant 2.000000e+00 : f32
    %48 = vector.broadcast %cst_9 : f32 to vector<8x32xf32>
    %49 = arith.mulf %48, %47 : vector<8x32xf32>
    %cst_10 = arith.constant 1.000000e+00 : f32
    %50 = vector.broadcast %cst_10 : f32 to vector<8x32xf32>
    %51 = arith.subf %49, %50 : vector<8x32xf32>
    %52 = vector.extract_strided_slice %46 {offsets = [0, 0], sizes = [8, 32], strides = [1, 1]} : vector<8x128xf32> to vector<8x32xf32>
    %53 = arith.mulf %52, %51 : vector<8x32xf32>
    %54 = vector.extract_strided_slice %46 {offsets = [0, 96], sizes = [8, 32], strides = [1, 1]} : vector<8x128xf32> to vector<8x32xf32>
    %55 = math.tanh %53 : vector<8x32xf32>
    %56 = arith.mulf %54, %55 : vector<8x32xf32>
    %57 = tpu.concatenate %56, %56 in 1 : vector<8x32xf32>, vector<8x32xf32> -> vector<8x64xf32>
    %58 = arith.mulf %57, %9 : vector<8x64xf32>
    %59 = arith.truncf %58 : vector<8x64xf32> to vector<8x64xbf16>
    %cst_11 = arith.constant dense<0.000000e+00> : vector<8x128xf32>
    %60 = tpu.matmul %59, %12, %cst_11 {dimension_numbers = #tpu.dot_dimension_numbers<[1], [0], [0], [1], [0, 0, 1, 1], [], []>} : vector<8x64xbf16>, vector<64x128xbf16>, vector<8x128xf32> -> vector<8x128xf32>
    %61 = arith.addf %23, %60 : vector<8x128xf32>
    %62 = arith.negf %61 : vector<8x128xf32>
    %63 = math.exp %62 : vector<8x128xf32>
    %cst_12 = arith.constant 1.000000e+00 : f32
    %64 = vector.broadcast %cst_12 : f32 to vector<8x128xf32>
    %65 = arith.addf %64, %63 : vector<8x128xf32>
    %66 = arith.divf %64, %65 : vector<8x128xf32>
    %67 = vector.extract_strided_slice %66 {offsets = [0, 64], sizes = [8, 32], strides = [1, 1]} : vector<8x128xf32> to vector<8x32xf32>
    %cst_13 = arith.constant 2.000000e+00 : f32
    %68 = vector.broadcast %cst_13 : f32 to vector<8x32xf32>
    %69 = arith.mulf %68, %67 : vector<8x32xf32>
    %cst_14 = arith.constant 1.000000e+00 : f32
    %70 = vector.broadcast %cst_14 : f32 to vector<8x32xf32>
    %71 = arith.subf %69, %70 : vector<8x32xf32>
    %72 = vector.extract_strided_slice %66 {offsets = [0, 32], sizes = [8, 32], strides = [1, 1]} : vector<8x128xf32> to vector<8x32xf32>
    %73 = arith.mulf %72, %53 : vector<8x32xf32>
    %74 = vector.extract_strided_slice %66 {offsets = [0, 0], sizes = [8, 32], strides = [1, 1]} : vector<8x128xf32> to vector<8x32xf32>
    %75 = arith.mulf %74, %71 : vector<8x32xf32>
    %76 = arith.addf %73, %75 : vector<8x32xf32>
    %77 = vector.extract_strided_slice %66 {offsets = [0, 96], sizes = [8, 32], strides = [1, 1]} : vector<8x128xf32> to vector<8x32xf32>
    %78 = math.tanh %76 : vector<8x32xf32>
    %79 = arith.mulf %77, %78 : vector<8x32xf32>
    %80 = tpu.concatenate %79, %79 in 1 : vector<8x32xf32>, vector<8x32xf32> -> vector<8x64xf32>
    %81 = arith.mulf %80, %9 : vector<8x64xf32>
    %82 = arith.truncf %81 : vector<8x64xf32> to vector<8x64xbf16>
    %cst_15 = arith.constant dense<0.000000e+00> : vector<8x128xf32>
    %83 = tpu.matmul %82, %12, %cst_15 {dimension_numbers = #tpu.dot_dimension_numbers<[1], [0], [0], [1], [0, 0, 1, 1], [], []>} : vector<8x64xbf16>, vector<64x128xbf16>, vector<8x128xf32> -> vector<8x128xf32>
    %84 = arith.addf %26, %83 : vector<8x128xf32>
    %85 = arith.negf %84 : vector<8x128xf32>
    %86 = math.exp %85 : vector<8x128xf32>
    %cst_16 = arith.constant 1.000000e+00 : f32
    %87 = vector.broadcast %cst_16 : f32 to vector<8x128xf32>
    %88 = arith.addf %87, %86 : vector<8x128xf32>
    %89 = arith.divf %87, %88 : vector<8x128xf32>
    %90 = vector.extract_strided_slice %89 {offsets = [0, 64], sizes = [8, 32], strides = [1, 1]} : vector<8x128xf32> to vector<8x32xf32>
    %cst_17 = arith.constant 2.000000e+00 : f32
    %91 = vector.broadcast %cst_17 : f32 to vector<8x32xf32>
    %92 = arith.mulf %91, %90 : vector<8x32xf32>
    %cst_18 = arith.constant 1.000000e+00 : f32
    %93 = vector.broadcast %cst_18 : f32 to vector<8x32xf32>
    %94 = arith.subf %92, %93 : vector<8x32xf32>
    %95 = vector.extract_strided_slice %89 {offsets = [0, 32], sizes = [8, 32], strides = [1, 1]} : vector<8x128xf32> to vector<8x32xf32>
    %96 = arith.mulf %95, %76 : vector<8x32xf32>
    %97 = vector.extract_strided_slice %89 {offsets = [0, 0], sizes = [8, 32], strides = [1, 1]} : vector<8x128xf32> to vector<8x32xf32>
    %98 = arith.mulf %97, %94 : vector<8x32xf32>
    %99 = arith.addf %96, %98 : vector<8x32xf32>
    %100 = vector.extract_strided_slice %89 {offsets = [0, 96], sizes = [8, 32], strides = [1, 1]} : vector<8x128xf32> to vector<8x32xf32>
    %101 = math.tanh %99 : vector<8x32xf32>
    %102 = arith.mulf %100, %101 : vector<8x32xf32>
    %103 = tpu.concatenate %102, %102 in 1 : vector<8x32xf32>, vector<8x32xf32> -> vector<8x64xf32>
    %104 = arith.mulf %103, %9 : vector<8x64xf32>
    %105 = arith.truncf %104 : vector<8x64xf32> to vector<8x64xbf16>
    %cst_19 = arith.constant dense<0.000000e+00> : vector<8x128xf32>
    %106 = tpu.matmul %105, %12, %cst_19 {dimension_numbers = #tpu.dot_dimension_numbers<[1], [0], [0], [1], [0, 0, 1, 1], [], []>} : vector<8x64xbf16>, vector<64x128xbf16>, vector<8x128xf32> -> vector<8x128xf32>
    %107 = arith.addf %29, %106 : vector<8x128xf32>
    %108 = arith.negf %107 : vector<8x128xf32>
    %109 = math.exp %108 : vector<8x128xf32>
    %cst_20 = arith.constant 1.000000e+00 : f32
    %110 = vector.broadcast %cst_20 : f32 to vector<8x128xf32>
    %111 = arith.addf %110, %109 : vector<8x128xf32>
    %112 = arith.divf %110, %111 : vector<8x128xf32>
    %113 = vector.extract_strided_slice %112 {offsets = [0, 64], sizes = [8, 32], strides = [1, 1]} : vector<8x128xf32> to vector<8x32xf32>
    %cst_21 = arith.constant 2.000000e+00 : f32
    %114 = vector.broadcast %cst_21 : f32 to vector<8x32xf32>
    %115 = arith.mulf %114, %113 : vector<8x32xf32>
    %cst_22 = arith.constant 1.000000e+00 : f32
    %116 = vector.broadcast %cst_22 : f32 to vector<8x32xf32>
    %117 = arith.subf %115, %116 : vector<8x32xf32>
    %118 = vector.extract_strided_slice %112 {offsets = [0, 32], sizes = [8, 32], strides = [1, 1]} : vector<8x128xf32> to vector<8x32xf32>
    %119 = arith.mulf %118, %99 : vector<8x32xf32>
    %120 = vector.extract_strided_slice %112 {offsets = [0, 0], sizes = [8, 32], strides = [1, 1]} : vector<8x128xf32> to vector<8x32xf32>
    %121 = arith.mulf %120, %117 : vector<8x32xf32>
    %122 = arith.addf %119, %121 : vector<8x32xf32>
    %123 = vector.extract_strided_slice %112 {offsets = [0, 96], sizes = [8, 32], strides = [1, 1]} : vector<8x128xf32> to vector<8x32xf32>
    %124 = math.tanh %122 : vector<8x32xf32>
    %125 = arith.mulf %123, %124 : vector<8x32xf32>
    %126 = tpu.concatenate %125, %125 in 1 : vector<8x32xf32>, vector<8x32xf32> -> vector<8x64xf32>
    %127 = arith.mulf %126, %9 : vector<8x64xf32>
    %128 = arith.truncf %127 : vector<8x64xf32> to vector<8x64xbf16>
    %cst_23 = arith.constant dense<0.000000e+00> : vector<8x128xf32>
    %129 = tpu.matmul %128, %12, %cst_23 {dimension_numbers = #tpu.dot_dimension_numbers<[1], [0], [0], [1], [0, 0, 1, 1], [], []>} : vector<8x64xbf16>, vector<64x128xbf16>, vector<8x128xf32> -> vector<8x128xf32>
    %130 = arith.addf %32, %129 : vector<8x128xf32>
    %131 = arith.negf %130 : vector<8x128xf32>
    %132 = math.exp %131 : vector<8x128xf32>
    %cst_24 = arith.constant 1.000000e+00 : f32
    %133 = vector.broadcast %cst_24 : f32 to vector<8x128xf32>
    %134 = arith.addf %133, %132 : vector<8x128xf32>
    %135 = arith.divf %133, %134 : vector<8x128xf32>
    %136 = vector.extract_strided_slice %135 {offsets = [0, 64], sizes = [8, 32], strides = [1, 1]} : vector<8x128xf32> to vector<8x32xf32>
    %cst_25 = arith.constant 2.000000e+00 : f32
    %137 = vector.broadcast %cst_25 : f32 to vector<8x32xf32>
    %138 = arith.mulf %137, %136 : vector<8x32xf32>
    %cst_26 = arith.constant 1.000000e+00 : f32
    %139 = vector.broadcast %cst_26 : f32 to vector<8x32xf32>
    %140 = arith.subf %138, %139 : vector<8x32xf32>
    %141 = vector.extract_strided_slice %135 {offsets = [0, 32], sizes = [8, 32], strides = [1, 1]} : vector<8x128xf32> to vector<8x32xf32>
    %142 = arith.mulf %141, %122 : vector<8x32xf32>
    %143 = vector.extract_strided_slice %135 {offsets = [0, 0], sizes = [8, 32], strides = [1, 1]} : vector<8x128xf32> to vector<8x32xf32>
    %144 = arith.mulf %143, %140 : vector<8x32xf32>
    %145 = arith.addf %142, %144 : vector<8x32xf32>
    %146 = vector.extract_strided_slice %135 {offsets = [0, 96], sizes = [8, 32], strides = [1, 1]} : vector<8x128xf32> to vector<8x32xf32>
    %147 = math.tanh %145 : vector<8x32xf32>
    %148 = arith.mulf %146, %147 : vector<8x32xf32>
    %149 = tpu.concatenate %148, %148 in 1 : vector<8x32xf32>, vector<8x32xf32> -> vector<8x64xf32>
    %150 = arith.mulf %149, %9 : vector<8x64xf32>
    %151 = arith.truncf %150 : vector<8x64xf32> to vector<8x64xbf16>
    %cst_27 = arith.constant dense<0.000000e+00> : vector<8x128xf32>
    %152 = tpu.matmul %151, %12, %cst_27 {dimension_numbers = #tpu.dot_dimension_numbers<[1], [0], [0], [1], [0, 0, 1, 1], [], []>} : vector<8x64xbf16>, vector<64x128xbf16>, vector<8x128xf32> -> vector<8x128xf32>
    %153 = arith.addf %35, %152 : vector<8x128xf32>
    %154 = arith.negf %153 : vector<8x128xf32>
    %155 = math.exp %154 : vector<8x128xf32>
    %cst_28 = arith.constant 1.000000e+00 : f32
    %156 = vector.broadcast %cst_28 : f32 to vector<8x128xf32>
    %157 = arith.addf %156, %155 : vector<8x128xf32>
    %158 = arith.divf %156, %157 : vector<8x128xf32>
    %159 = vector.extract_strided_slice %158 {offsets = [0, 64], sizes = [8, 32], strides = [1, 1]} : vector<8x128xf32> to vector<8x32xf32>
    %cst_29 = arith.constant 2.000000e+00 : f32
    %160 = vector.broadcast %cst_29 : f32 to vector<8x32xf32>
    %161 = arith.mulf %160, %159 : vector<8x32xf32>
    %cst_30 = arith.constant 1.000000e+00 : f32
    %162 = vector.broadcast %cst_30 : f32 to vector<8x32xf32>
    %163 = arith.subf %161, %162 : vector<8x32xf32>
    %164 = vector.extract_strided_slice %158 {offsets = [0, 32], sizes = [8, 32], strides = [1, 1]} : vector<8x128xf32> to vector<8x32xf32>
    %165 = arith.mulf %164, %145 : vector<8x32xf32>
    %166 = vector.extract_strided_slice %158 {offsets = [0, 0], sizes = [8, 32], strides = [1, 1]} : vector<8x128xf32> to vector<8x32xf32>
    %167 = arith.mulf %166, %163 : vector<8x32xf32>
    %168 = arith.addf %165, %167 : vector<8x32xf32>
    %169 = vector.extract_strided_slice %158 {offsets = [0, 96], sizes = [8, 32], strides = [1, 1]} : vector<8x128xf32> to vector<8x32xf32>
    %170 = math.tanh %168 : vector<8x32xf32>
    %171 = arith.mulf %169, %170 : vector<8x32xf32>
    %172 = tpu.concatenate %171, %171 in 1 : vector<8x32xf32>, vector<8x32xf32> -> vector<8x64xf32>
    %173 = arith.mulf %172, %9 : vector<8x64xf32>
    %174 = arith.truncf %173 : vector<8x64xf32> to vector<8x64xbf16>
    %cst_31 = arith.constant dense<0.000000e+00> : vector<8x128xf32>
    %175 = tpu.matmul %174, %12, %cst_31 {dimension_numbers = #tpu.dot_dimension_numbers<[1], [0], [0], [1], [0, 0, 1, 1], [], []>} : vector<8x64xbf16>, vector<64x128xbf16>, vector<8x128xf32> -> vector<8x128xf32>
    %176 = arith.addf %38, %175 : vector<8x128xf32>
    %177 = arith.negf %176 : vector<8x128xf32>
    %178 = math.exp %177 : vector<8x128xf32>
    %cst_32 = arith.constant 1.000000e+00 : f32
    %179 = vector.broadcast %cst_32 : f32 to vector<8x128xf32>
    %180 = arith.addf %179, %178 : vector<8x128xf32>
    %181 = arith.divf %179, %180 : vector<8x128xf32>
    %182 = vector.extract_strided_slice %181 {offsets = [0, 64], sizes = [8, 32], strides = [1, 1]} : vector<8x128xf32> to vector<8x32xf32>
    %cst_33 = arith.constant 2.000000e+00 : f32
    %183 = vector.broadcast %cst_33 : f32 to vector<8x32xf32>
    %184 = arith.mulf %183, %182 : vector<8x32xf32>
    %cst_34 = arith.constant 1.000000e+00 : f32
    %185 = vector.broadcast %cst_34 : f32 to vector<8x32xf32>
    %186 = arith.subf %184, %185 : vector<8x32xf32>
    %187 = vector.extract_strided_slice %181 {offsets = [0, 32], sizes = [8, 32], strides = [1, 1]} : vector<8x128xf32> to vector<8x32xf32>
    %188 = arith.mulf %187, %168 : vector<8x32xf32>
    %189 = vector.extract_strided_slice %181 {offsets = [0, 0], sizes = [8, 32], strides = [1, 1]} : vector<8x128xf32> to vector<8x32xf32>
    %190 = arith.mulf %189, %186 : vector<8x32xf32>
    %191 = arith.addf %188, %190 : vector<8x32xf32>
    %192 = vector.extract_strided_slice %181 {offsets = [0, 96], sizes = [8, 32], strides = [1, 1]} : vector<8x128xf32> to vector<8x32xf32>
    %193 = math.tanh %191 : vector<8x32xf32>
    %194 = arith.mulf %192, %193 : vector<8x32xf32>
    %195 = tpu.concatenate %194, %194 in 1 : vector<8x32xf32>, vector<8x32xf32> -> vector<8x64xf32>
    %196 = arith.mulf %195, %9 : vector<8x64xf32>
    %197 = arith.truncf %196 : vector<8x64xf32> to vector<8x64xbf16>
    %cst_35 = arith.constant dense<0.000000e+00> : vector<8x128xf32>
    %198 = tpu.matmul %197, %12, %cst_35 {dimension_numbers = #tpu.dot_dimension_numbers<[1], [0], [0], [1], [0, 0, 1, 1], [], []>} : vector<8x64xbf16>, vector<64x128xbf16>, vector<8x128xf32> -> vector<8x128xf32>
    %199 = arith.addf %41, %198 : vector<8x128xf32>
    %200 = arith.negf %199 : vector<8x128xf32>
    %201 = math.exp %200 : vector<8x128xf32>
    %cst_36 = arith.constant 1.000000e+00 : f32
    %202 = vector.broadcast %cst_36 : f32 to vector<8x128xf32>
    %203 = arith.addf %202, %201 : vector<8x128xf32>
    %204 = arith.divf %202, %203 : vector<8x128xf32>
    %205 = vector.extract_strided_slice %204 {offsets = [0, 64], sizes = [8, 32], strides = [1, 1]} : vector<8x128xf32> to vector<8x32xf32>
    %cst_37 = arith.constant 2.000000e+00 : f32
    %206 = vector.broadcast %cst_37 : f32 to vector<8x32xf32>
    %207 = arith.mulf %206, %205 : vector<8x32xf32>
    %cst_38 = arith.constant 1.000000e+00 : f32
    %208 = vector.broadcast %cst_38 : f32 to vector<8x32xf32>
    %209 = arith.subf %207, %208 : vector<8x32xf32>
    %210 = vector.extract_strided_slice %204 {offsets = [0, 32], sizes = [8, 32], strides = [1, 1]} : vector<8x128xf32> to vector<8x32xf32>
    %211 = arith.mulf %210, %191 : vector<8x32xf32>
    %212 = vector.extract_strided_slice %204 {offsets = [0, 0], sizes = [8, 32], strides = [1, 1]} : vector<8x128xf32> to vector<8x32xf32>
    %213 = arith.mulf %212, %209 : vector<8x32xf32>
    %214 = arith.addf %211, %213 : vector<8x32xf32>
    %215 = vector.extract_strided_slice %204 {offsets = [0, 96], sizes = [8, 32], strides = [1, 1]} : vector<8x128xf32> to vector<8x32xf32>
    %216 = math.tanh %214 : vector<8x32xf32>
    %217 = arith.mulf %215, %216 : vector<8x32xf32>
    %218 = vector.extract_strided_slice %56 {offsets = [0, 0], sizes = [4, 32], strides = [1, 1]} : vector<8x32xf32> to vector<4x32xf32>
    %219 = vector.extract_strided_slice %217 {offsets = [4, 0], sizes = [4, 32], strides = [1, 1]} : vector<8x32xf32> to vector<4x32xf32>
    %220 = tpu.concatenate %218, %219 in 1 : vector<4x32xf32>, vector<4x32xf32> -> vector<4x64xf32>
    %221 = vector.extract_strided_slice %79 {offsets = [0, 0], sizes = [4, 32], strides = [1, 1]} : vector<8x32xf32> to vector<4x32xf32>
    %222 = vector.extract_strided_slice %194 {offsets = [4, 0], sizes = [4, 32], strides = [1, 1]} : vector<8x32xf32> to vector<4x32xf32>
    %223 = tpu.concatenate %221, %222 in 1 : vector<4x32xf32>, vector<4x32xf32> -> vector<4x64xf32>
    %224 = vector.extract_strided_slice %102 {offsets = [0, 0], sizes = [4, 32], strides = [1, 1]} : vector<8x32xf32> to vector<4x32xf32>
    %225 = vector.extract_strided_slice %171 {offsets = [4, 0], sizes = [4, 32], strides = [1, 1]} : vector<8x32xf32> to vector<4x32xf32>
    %226 = tpu.concatenate %224, %225 in 1 : vector<4x32xf32>, vector<4x32xf32> -> vector<4x64xf32>
    %227 = vector.extract_strided_slice %125 {offsets = [0, 0], sizes = [4, 32], strides = [1, 1]} : vector<8x32xf32> to vector<4x32xf32>
    %228 = vector.extract_strided_slice %148 {offsets = [4, 0], sizes = [4, 32], strides = [1, 1]} : vector<8x32xf32> to vector<4x32xf32>
    %229 = tpu.concatenate %227, %228 in 1 : vector<4x32xf32>, vector<4x32xf32> -> vector<4x64xf32>
    %230 = vector.extract_strided_slice %148 {offsets = [0, 0], sizes = [4, 32], strides = [1, 1]} : vector<8x32xf32> to vector<4x32xf32>
    %231 = vector.extract_strided_slice %125 {offsets = [4, 0], sizes = [4, 32], strides = [1, 1]} : vector<8x32xf32> to vector<4x32xf32>
    %232 = tpu.concatenate %230, %231 in 1 : vector<4x32xf32>, vector<4x32xf32> -> vector<4x64xf32>
    %233 = vector.extract_strided_slice %171 {offsets = [0, 0], sizes = [4, 32], strides = [1, 1]} : vector<8x32xf32> to vector<4x32xf32>
    %234 = vector.extract_strided_slice %102 {offsets = [4, 0], sizes = [4, 32], strides = [1, 1]} : vector<8x32xf32> to vector<4x32xf32>
    %235 = tpu.concatenate %233, %234 in 1 : vector<4x32xf32>, vector<4x32xf32> -> vector<4x64xf32>
    %236 = vector.extract_strided_slice %194 {offsets = [0, 0], sizes = [4, 32], strides = [1, 1]} : vector<8x32xf32> to vector<4x32xf32>
    %237 = vector.extract_strided_slice %79 {offsets = [4, 0], sizes = [4, 32], strides = [1, 1]} : vector<8x32xf32> to vector<4x32xf32>
    %238 = tpu.concatenate %236, %237 in 1 : vector<4x32xf32>, vector<4x32xf32> -> vector<4x64xf32>
    %239 = vector.extract_strided_slice %217 {offsets = [0, 0], sizes = [4, 32], strides = [1, 1]} : vector<8x32xf32> to vector<4x32xf32>
    %240 = vector.extract_strided_slice %56 {offsets = [4, 0], sizes = [4, 32], strides = [1, 1]} : vector<8x32xf32> to vector<4x32xf32>
    %241 = tpu.concatenate %239, %240 in 1 : vector<4x32xf32>, vector<4x32xf32> -> vector<4x64xf32>
    %242 = tpu.concatenate %220, %223, %226, %229, %232, %235, %238, %241 in 0 : vector<4x64xf32>, vector<4x64xf32>, vector<4x64xf32>, vector<4x64xf32>, vector<4x64xf32>, vector<4x64xf32>, vector<4x64xf32>, vector<4x64xf32> -> vector<32x64xf32>
    %243 = arith.truncf %242 : vector<32x64xf32> to vector<32x64xbf16>
    %cst_39 = arith.constant dense<0.000000e+00> : vector<32x32xf32>
    %244 = tpu.matmul %243, %243, %cst_39 {dimension_numbers = #tpu.dot_dimension_numbers<[1], [1], [0], [0], [0, 0, 1, 0], [], []>} : vector<32x64xbf16>, vector<32x64xbf16>, vector<32x32xf32> -> vector<32x32xf32>
    %245 = tpu.iota {dimensions = array<i32: 0>} : vector<32x32xi32>
    %246 = tpu.iota {dimensions = array<i32: 1>} : vector<32x32xi32>
    %c4_i32_40 = arith.constant 4 : i32
    %c0_i32 = arith.constant 0 : i32
    %247 = arith.cmpi eq, %c4_i32_40, %c0_i32 : i32
    %c1_i32 = arith.constant 1 : i32
    %248 = arith.select %247, %c1_i32, %c4_i32_40 : i32
    %249 = vector.broadcast %248 : i32 to vector<32x32xi32>
    %250 = arith.remsi %245, %249 : vector<32x32xi32>
    %c0_i32_41 = arith.constant 0 : i32
    %251 = vector.broadcast %c0_i32_41 : i32 to vector<32x32xi32>
    %252 = arith.cmpi ne, %250, %251 : vector<32x32xi32>
    %c0_i32_42 = arith.constant 0 : i32
    %253 = vector.broadcast %c0_i32_42 : i32 to vector<32x32xi32>
    %254 = arith.cmpi slt, %250, %253 : vector<32x32xi32>
    %c0_i32_43 = arith.constant 0 : i32
    %255 = arith.cmpi slt, %248, %c0_i32_43 : i32
    %256 = vector.broadcast %255 : i1 to vector<32x32xi1>
    %257 = vector.broadcast %256 : vector<32x32xi1> to vector<32x32xi1>
    %258 = arith.xori %254, %257 : vector<32x32xi1>
    %259 = arith.andi %258, %252 : vector<32x32xi1>
    %260 = vector.broadcast %248 : i32 to vector<32x32xi32>
    %261 = arith.addi %250, %260 : vector<32x32xi32>
    %262 = arith.select %259, %261, %250 : vector<32x32xi1>, vector<32x32xi32>
    %c2_i32 = arith.constant 2 : i32
    %263 = vector.broadcast %c2_i32 : i32 to vector<32x32xi32>
    %264 = arith.addi %262, %263 : vector<32x32xi32>
    %c4_i32_44 = arith.constant 4 : i32
    %c0_i32_45 = arith.constant 0 : i32
    %265 = arith.cmpi eq, %c4_i32_44, %c0_i32_45 : i32
    %c1_i32_46 = arith.constant 1 : i32
    %266 = arith.select %265, %c1_i32_46, %c4_i32_44 : i32
    %267 = vector.broadcast %266 : i32 to vector<32x32xi32>
    %268 = arith.remsi %264, %267 : vector<32x32xi32>
    %c0_i32_47 = arith.constant 0 : i32
    %269 = vector.broadcast %c0_i32_47 : i32 to vector<32x32xi32>
    %270 = arith.cmpi ne, %268, %269 : vector<32x32xi32>
    %c0_i32_48 = arith.constant 0 : i32
    %271 = vector.broadcast %c0_i32_48 : i32 to vector<32x32xi32>
    %272 = arith.cmpi slt, %268, %271 : vector<32x32xi32>
    %c0_i32_49 = arith.constant 0 : i32
    %273 = arith.cmpi slt, %266, %c0_i32_49 : i32
    %274 = vector.broadcast %273 : i1 to vector<32x32xi1>
    %275 = vector.broadcast %274 : vector<32x32xi1> to vector<32x32xi1>
    %276 = arith.xori %272, %275 : vector<32x32xi1>
    %277 = arith.andi %276, %270 : vector<32x32xi1>
    %278 = vector.broadcast %266 : i32 to vector<32x32xi32>
    %279 = arith.addi %268, %278 : vector<32x32xi32>
    %280 = arith.select %277, %279, %268 : vector<32x32xi1>, vector<32x32xi32>
    %c4_i32_50 = arith.constant 4 : i32
    %c0_i32_51 = arith.constant 0 : i32
    %281 = arith.cmpi eq, %c4_i32_50, %c0_i32_51 : i32
    %c1_i32_52 = arith.constant 1 : i32
    %282 = arith.select %281, %c1_i32_52, %c4_i32_50 : i32
    %283 = vector.broadcast %282 : i32 to vector<32x32xi32>
    %284 = arith.remsi %246, %283 : vector<32x32xi32>
    %c0_i32_53 = arith.constant 0 : i32
    %285 = vector.broadcast %c0_i32_53 : i32 to vector<32x32xi32>
    %286 = arith.cmpi ne, %284, %285 : vector<32x32xi32>
    %c0_i32_54 = arith.constant 0 : i32
    %287 = vector.broadcast %c0_i32_54 : i32 to vector<32x32xi32>
    %288 = arith.cmpi slt, %284, %287 : vector<32x32xi32>
    %c0_i32_55 = arith.constant 0 : i32
    %289 = arith.cmpi slt, %282, %c0_i32_55 : i32
    %290 = vector.broadcast %289 : i1 to vector<32x32xi1>
    %291 = vector.broadcast %290 : vector<32x32xi1> to vector<32x32xi1>
    %292 = arith.xori %288, %291 : vector<32x32xi1>
    %293 = arith.andi %292, %286 : vector<32x32xi1>
    %294 = vector.broadcast %282 : i32 to vector<32x32xi32>
    %295 = arith.addi %284, %294 : vector<32x32xi32>
    %296 = arith.select %293, %295, %284 : vector<32x32xi1>, vector<32x32xi32>
    %297 = arith.cmpi eq, %280, %296 : vector<32x32xi32>
    %cst_56 = arith.constant -1.000000e+30 : f32
    %298 = vector.broadcast %cst_56 : f32 to vector<32x32xf32>
    %299 = arith.select %297, %244, %298 : vector<32x32xi1>, vector<32x32xf32>
    %cst_57 = arith.constant dense<0xFF800000> : vector<32xf32>
    %300 = vector.multi_reduction <maximumf>, %299, %cst_57 [1] : vector<32x32xf32> to vector<32xf32>
    %301 = vector.shape_cast %300 : vector<32xf32> to vector<32x1xf32>
    %302 = vector.broadcast %301 : vector<32x1xf32> to vector<32x32xf32>
    %303 = arith.subf %299, %302 : vector<32x32xf32>
    %304 = math.exp %303 : vector<32x32xf32>
    %cst_58 = arith.constant 0.000000e+00 : f32
    %305 = vector.broadcast %cst_58 : f32 to vector<32x32xf32>
    %306 = arith.select %297, %304, %305 : vector<32x32xi1>, vector<32x32xf32>
    %cst_59 = arith.constant dense<0.000000e+00> : vector<32xf32>
    %307 = vector.multi_reduction <add>, %306, %cst_59 [1] : vector<32x32xf32> to vector<32xf32>
    %308 = vector.shape_cast %307 : vector<32xf32> to vector<32x1xf32>
    %309 = vector.broadcast %308 : vector<32x1xf32> to vector<32x32xf32>
    %310 = arith.divf %306, %309 : vector<32x32xf32>
    %311 = arith.truncf %310 : vector<32x32xf32> to vector<32x32xbf16>
    %cst_60 = arith.constant dense<0.000000e+00> : vector<32x64xf32>
    %312 = tpu.matmul %311, %243, %cst_60 {dimension_numbers = #tpu.dot_dimension_numbers<[1], [0], [0], [1], [0, 0, 1, 1], [], []>} : vector<32x32xbf16>, vector<32x64xbf16>, vector<32x64xf32> -> vector<32x64xf32>
    %313 = arith.subf %242, %312 : vector<32x64xf32>
    %314 = arith.mulf %242, %312 : vector<32x64xf32>
    %315 = tpu.concatenate %242, %312, %313, %314 in 1 : vector<32x64xf32>, vector<32x64xf32>, vector<32x64xf32>, vector<32x64xf32> -> vector<32x256xf32>
    %c0_61 = arith.constant 0 : index
    %c0_62 = arith.constant 0 : index
    %316 = vector.load %arg4[%c0_61, %c0_62] : memref<256x256xbf16, #tpu.memory_space<vmem>>, vector<256x256xbf16>
    %c0_63 = arith.constant 0 : index
    %c0_64 = arith.constant 0 : index
    %317 = vector.load %arg5[%c0_63, %c0_64] : memref<64x128xbf16, #tpu.memory_space<vmem>>, vector<64x128xbf16>
    %c0_65 = arith.constant 0 : index
    %c0_66 = arith.constant 0 : index
    %318 = vector.load %arg6[%c0_65, %c0_66] : memref<1x256xf32, #tpu.memory_space<vmem>>, vector<1x256xf32>
    %319 = arith.truncf %315 : vector<32x256xf32> to vector<32x256xbf16>
    %cst_67 = arith.constant dense<0.000000e+00> : vector<32x256xf32>
    %320 = tpu.matmul %319, %316, %cst_67 {dimension_numbers = #tpu.dot_dimension_numbers<[1], [0], [0], [1], [0, 0, 1, 1], [], []>} : vector<32x256xbf16>, vector<256x256xbf16>, vector<32x256xf32> -> vector<32x256xf32>
    %321 = vector.broadcast %318 : vector<1x256xf32> to vector<32x256xf32>
    %322 = arith.addf %320, %321 : vector<32x256xf32>
    %323 = vector.extract_strided_slice %322 {offsets = [0, 0], sizes = [4, 128], strides = [1, 1]} : vector<32x256xf32> to vector<4x128xf32>
    %324 = vector.extract_strided_slice %322 {offsets = [28, 128], sizes = [4, 128], strides = [1, 1]} : vector<32x256xf32> to vector<4x128xf32>
    %325 = tpu.concatenate %323, %324 in 0 : vector<4x128xf32>, vector<4x128xf32> -> vector<8x128xf32>
    %326 = vector.extract_strided_slice %322 {offsets = [4, 0], sizes = [4, 128], strides = [1, 1]} : vector<32x256xf32> to vector<4x128xf32>
    %327 = vector.extract_strided_slice %322 {offsets = [24, 128], sizes = [4, 128], strides = [1, 1]} : vector<32x256xf32> to vector<4x128xf32>
    %328 = tpu.concatenate %326, %327 in 0 : vector<4x128xf32>, vector<4x128xf32> -> vector<8x128xf32>
    %329 = vector.extract_strided_slice %322 {offsets = [8, 0], sizes = [4, 128], strides = [1, 1]} : vector<32x256xf32> to vector<4x128xf32>
    %330 = vector.extract_strided_slice %322 {offsets = [20, 128], sizes = [4, 128], strides = [1, 1]} : vector<32x256xf32> to vector<4x128xf32>
    %331 = tpu.concatenate %329, %330 in 0 : vector<4x128xf32>, vector<4x128xf32> -> vector<8x128xf32>
    %332 = vector.extract_strided_slice %322 {offsets = [12, 0], sizes = [4, 128], strides = [1, 1]} : vector<32x256xf32> to vector<4x128xf32>
    %333 = vector.extract_strided_slice %322 {offsets = [16, 128], sizes = [4, 128], strides = [1, 1]} : vector<32x256xf32> to vector<4x128xf32>
    %334 = tpu.concatenate %332, %333 in 0 : vector<4x128xf32>, vector<4x128xf32> -> vector<8x128xf32>
    %335 = vector.extract_strided_slice %322 {offsets = [16, 0], sizes = [4, 128], strides = [1, 1]} : vector<32x256xf32> to vector<4x128xf32>
    %336 = vector.extract_strided_slice %322 {offsets = [12, 128], sizes = [4, 128], strides = [1, 1]} : vector<32x256xf32> to vector<4x128xf32>
    %337 = tpu.concatenate %335, %336 in 0 : vector<4x128xf32>, vector<4x128xf32> -> vector<8x128xf32>
    %338 = vector.extract_strided_slice %322 {offsets = [20, 0], sizes = [4, 128], strides = [1, 1]} : vector<32x256xf32> to vector<4x128xf32>
    %339 = vector.extract_strided_slice %322 {offsets = [8, 128], sizes = [4, 128], strides = [1, 1]} : vector<32x256xf32> to vector<4x128xf32>
    %340 = tpu.concatenate %338, %339 in 0 : vector<4x128xf32>, vector<4x128xf32> -> vector<8x128xf32>
    %341 = vector.extract_strided_slice %322 {offsets = [24, 0], sizes = [4, 128], strides = [1, 1]} : vector<32x256xf32> to vector<4x128xf32>
    %342 = vector.extract_strided_slice %322 {offsets = [4, 128], sizes = [4, 128], strides = [1, 1]} : vector<32x256xf32> to vector<4x128xf32>
    %343 = tpu.concatenate %341, %342 in 0 : vector<4x128xf32>, vector<4x128xf32> -> vector<8x128xf32>
    %344 = vector.extract_strided_slice %322 {offsets = [28, 0], sizes = [4, 128], strides = [1, 1]} : vector<32x256xf32> to vector<4x128xf32>
    %345 = vector.extract_strided_slice %322 {offsets = [0, 128], sizes = [4, 128], strides = [1, 1]} : vector<32x256xf32> to vector<4x128xf32>
    %346 = tpu.concatenate %344, %345 in 0 : vector<4x128xf32>, vector<4x128xf32> -> vector<8x128xf32>
    %347 = arith.negf %325 : vector<8x128xf32>
    %348 = math.exp %347 : vector<8x128xf32>
    %cst_68 = arith.constant 1.000000e+00 : f32
    %349 = vector.broadcast %cst_68 : f32 to vector<8x128xf32>
    %350 = arith.addf %349, %348 : vector<8x128xf32>
    %351 = arith.divf %349, %350 : vector<8x128xf32>
    %352 = vector.extract_strided_slice %351 {offsets = [0, 64], sizes = [8, 32], strides = [1, 1]} : vector<8x128xf32> to vector<8x32xf32>
    %cst_69 = arith.constant 2.000000e+00 : f32
    %353 = vector.broadcast %cst_69 : f32 to vector<8x32xf32>
    %354 = arith.mulf %353, %352 : vector<8x32xf32>
    %cst_70 = arith.constant 1.000000e+00 : f32
    %355 = vector.broadcast %cst_70 : f32 to vector<8x32xf32>
    %356 = arith.subf %354, %355 : vector<8x32xf32>
    %357 = vector.extract_strided_slice %351 {offsets = [0, 0], sizes = [8, 32], strides = [1, 1]} : vector<8x128xf32> to vector<8x32xf32>
    %358 = arith.mulf %357, %356 : vector<8x32xf32>
    %359 = vector.extract_strided_slice %351 {offsets = [0, 96], sizes = [8, 32], strides = [1, 1]} : vector<8x128xf32> to vector<8x32xf32>
    %360 = math.tanh %358 : vector<8x32xf32>
    %361 = arith.mulf %359, %360 : vector<8x32xf32>
    %362 = tpu.concatenate %361, %361 in 1 : vector<8x32xf32>, vector<8x32xf32> -> vector<8x64xf32>
    %363 = arith.mulf %362, %9 : vector<8x64xf32>
    %364 = arith.truncf %363 : vector<8x64xf32> to vector<8x64xbf16>
    %cst_71 = arith.constant dense<0.000000e+00> : vector<8x128xf32>
    %365 = tpu.matmul %364, %317, %cst_71 {dimension_numbers = #tpu.dot_dimension_numbers<[1], [0], [0], [1], [0, 0, 1, 1], [], []>} : vector<8x64xbf16>, vector<64x128xbf16>, vector<8x128xf32> -> vector<8x128xf32>
    %366 = arith.addf %328, %365 : vector<8x128xf32>
    %367 = arith.negf %366 : vector<8x128xf32>
    %368 = math.exp %367 : vector<8x128xf32>
    %cst_72 = arith.constant 1.000000e+00 : f32
    %369 = vector.broadcast %cst_72 : f32 to vector<8x128xf32>
    %370 = arith.addf %369, %368 : vector<8x128xf32>
    %371 = arith.divf %369, %370 : vector<8x128xf32>
    %372 = vector.extract_strided_slice %371 {offsets = [0, 64], sizes = [8, 32], strides = [1, 1]} : vector<8x128xf32> to vector<8x32xf32>
    %cst_73 = arith.constant 2.000000e+00 : f32
    %373 = vector.broadcast %cst_73 : f32 to vector<8x32xf32>
    %374 = arith.mulf %373, %372 : vector<8x32xf32>
    %cst_74 = arith.constant 1.000000e+00 : f32
    %375 = vector.broadcast %cst_74 : f32 to vector<8x32xf32>
    %376 = arith.subf %374, %375 : vector<8x32xf32>
    %377 = vector.extract_strided_slice %371 {offsets = [0, 32], sizes = [8, 32], strides = [1, 1]} : vector<8x128xf32> to vector<8x32xf32>
    %378 = arith.mulf %377, %358 : vector<8x32xf32>
    %379 = vector.extract_strided_slice %371 {offsets = [0, 0], sizes = [8, 32], strides = [1, 1]} : vector<8x128xf32> to vector<8x32xf32>
    %380 = arith.mulf %379, %376 : vector<8x32xf32>
    %381 = arith.addf %378, %380 : vector<8x32xf32>
    %382 = vector.extract_strided_slice %371 {offsets = [0, 96], sizes = [8, 32], strides = [1, 1]} : vector<8x128xf32> to vector<8x32xf32>
    %383 = math.tanh %381 : vector<8x32xf32>
    %384 = arith.mulf %382, %383 : vector<8x32xf32>
    %385 = tpu.concatenate %384, %384 in 1 : vector<8x32xf32>, vector<8x32xf32> -> vector<8x64xf32>
    %386 = arith.mulf %385, %9 : vector<8x64xf32>
    %387 = arith.truncf %386 : vector<8x64xf32> to vector<8x64xbf16>
    %cst_75 = arith.constant dense<0.000000e+00> : vector<8x128xf32>
    %388 = tpu.matmul %387, %317, %cst_75 {dimension_numbers = #tpu.dot_dimension_numbers<[1], [0], [0], [1], [0, 0, 1, 1], [], []>} : vector<8x64xbf16>, vector<64x128xbf16>, vector<8x128xf32> -> vector<8x128xf32>
    %389 = arith.addf %331, %388 : vector<8x128xf32>
    %390 = arith.negf %389 : vector<8x128xf32>
    %391 = math.exp %390 : vector<8x128xf32>
    %cst_76 = arith.constant 1.000000e+00 : f32
    %392 = vector.broadcast %cst_76 : f32 to vector<8x128xf32>
    %393 = arith.addf %392, %391 : vector<8x128xf32>
    %394 = arith.divf %392, %393 : vector<8x128xf32>
    %395 = vector.extract_strided_slice %394 {offsets = [0, 64], sizes = [8, 32], strides = [1, 1]} : vector<8x128xf32> to vector<8x32xf32>
    %cst_77 = arith.constant 2.000000e+00 : f32
    %396 = vector.broadcast %cst_77 : f32 to vector<8x32xf32>
    %397 = arith.mulf %396, %395 : vector<8x32xf32>
    %cst_78 = arith.constant 1.000000e+00 : f32
    %398 = vector.broadcast %cst_78 : f32 to vector<8x32xf32>
    %399 = arith.subf %397, %398 : vector<8x32xf32>
    %400 = vector.extract_strided_slice %394 {offsets = [0, 32], sizes = [8, 32], strides = [1, 1]} : vector<8x128xf32> to vector<8x32xf32>
    %401 = arith.mulf %400, %381 : vector<8x32xf32>
    %402 = vector.extract_strided_slice %394 {offsets = [0, 0], sizes = [8, 32], strides = [1, 1]} : vector<8x128xf32> to vector<8x32xf32>
    %403 = arith.mulf %402, %399 : vector<8x32xf32>
    %404 = arith.addf %401, %403 : vector<8x32xf32>
    %405 = vector.extract_strided_slice %394 {offsets = [0, 96], sizes = [8, 32], strides = [1, 1]} : vector<8x128xf32> to vector<8x32xf32>
    %406 = math.tanh %404 : vector<8x32xf32>
    %407 = arith.mulf %405, %406 : vector<8x32xf32>
    %408 = tpu.concatenate %407, %407 in 1 : vector<8x32xf32>, vector<8x32xf32> -> vector<8x64xf32>
    %409 = arith.mulf %408, %9 : vector<8x64xf32>
    %410 = arith.truncf %409 : vector<8x64xf32> to vector<8x64xbf16>
    %cst_79 = arith.constant dense<0.000000e+00> : vector<8x128xf32>
    %411 = tpu.matmul %410, %317, %cst_79 {dimension_numbers = #tpu.dot_dimension_numbers<[1], [0], [0], [1], [0, 0, 1, 1], [], []>} : vector<8x64xbf16>, vector<64x128xbf16>, vector<8x128xf32> -> vector<8x128xf32>
    %412 = arith.addf %334, %411 : vector<8x128xf32>
    %413 = arith.negf %412 : vector<8x128xf32>
    %414 = math.exp %413 : vector<8x128xf32>
    %cst_80 = arith.constant 1.000000e+00 : f32
    %415 = vector.broadcast %cst_80 : f32 to vector<8x128xf32>
    %416 = arith.addf %415, %414 : vector<8x128xf32>
    %417 = arith.divf %415, %416 : vector<8x128xf32>
    %418 = vector.extract_strided_slice %417 {offsets = [0, 64], sizes = [8, 32], strides = [1, 1]} : vector<8x128xf32> to vector<8x32xf32>
    %cst_81 = arith.constant 2.000000e+00 : f32
    %419 = vector.broadcast %cst_81 : f32 to vector<8x32xf32>
    %420 = arith.mulf %419, %418 : vector<8x32xf32>
    %cst_82 = arith.constant 1.000000e+00 : f32
    %421 = vector.broadcast %cst_82 : f32 to vector<8x32xf32>
    %422 = arith.subf %420, %421 : vector<8x32xf32>
    %423 = vector.extract_strided_slice %417 {offsets = [0, 32], sizes = [8, 32], strides = [1, 1]} : vector<8x128xf32> to vector<8x32xf32>
    %424 = arith.mulf %423, %404 : vector<8x32xf32>
    %425 = vector.extract_strided_slice %417 {offsets = [0, 0], sizes = [8, 32], strides = [1, 1]} : vector<8x128xf32> to vector<8x32xf32>
    %426 = arith.mulf %425, %422 : vector<8x32xf32>
    %427 = arith.addf %424, %426 : vector<8x32xf32>
    %428 = vector.extract_strided_slice %417 {offsets = [0, 96], sizes = [8, 32], strides = [1, 1]} : vector<8x128xf32> to vector<8x32xf32>
    %429 = math.tanh %427 : vector<8x32xf32>
    %430 = arith.mulf %428, %429 : vector<8x32xf32>
    %431 = tpu.concatenate %430, %430 in 1 : vector<8x32xf32>, vector<8x32xf32> -> vector<8x64xf32>
    %432 = arith.mulf %431, %9 : vector<8x64xf32>
    %433 = arith.truncf %432 : vector<8x64xf32> to vector<8x64xbf16>
    %cst_83 = arith.constant dense<0.000000e+00> : vector<8x128xf32>
    %434 = tpu.matmul %433, %317, %cst_83 {dimension_numbers = #tpu.dot_dimension_numbers<[1], [0], [0], [1], [0, 0, 1, 1], [], []>} : vector<8x64xbf16>, vector<64x128xbf16>, vector<8x128xf32> -> vector<8x128xf32>
    %435 = arith.addf %337, %434 : vector<8x128xf32>
    %436 = arith.negf %435 : vector<8x128xf32>
    %437 = math.exp %436 : vector<8x128xf32>
    %cst_84 = arith.constant 1.000000e+00 : f32
    %438 = vector.broadcast %cst_84 : f32 to vector<8x128xf32>
    %439 = arith.addf %438, %437 : vector<8x128xf32>
    %440 = arith.divf %438, %439 : vector<8x128xf32>
    %441 = vector.extract_strided_slice %440 {offsets = [0, 64], sizes = [8, 32], strides = [1, 1]} : vector<8x128xf32> to vector<8x32xf32>
    %cst_85 = arith.constant 2.000000e+00 : f32
    %442 = vector.broadcast %cst_85 : f32 to vector<8x32xf32>
    %443 = arith.mulf %442, %441 : vector<8x32xf32>
    %cst_86 = arith.constant 1.000000e+00 : f32
    %444 = vector.broadcast %cst_86 : f32 to vector<8x32xf32>
    %445 = arith.subf %443, %444 : vector<8x32xf32>
    %446 = vector.extract_strided_slice %440 {offsets = [0, 32], sizes = [8, 32], strides = [1, 1]} : vector<8x128xf32> to vector<8x32xf32>
    %447 = arith.mulf %446, %427 : vector<8x32xf32>
    %448 = vector.extract_strided_slice %440 {offsets = [0, 0], sizes = [8, 32], strides = [1, 1]} : vector<8x128xf32> to vector<8x32xf32>
    %449 = arith.mulf %448, %445 : vector<8x32xf32>
    %450 = arith.addf %447, %449 : vector<8x32xf32>
    %451 = vector.extract_strided_slice %440 {offsets = [0, 96], sizes = [8, 32], strides = [1, 1]} : vector<8x128xf32> to vector<8x32xf32>
    %452 = math.tanh %450 : vector<8x32xf32>
    %453 = arith.mulf %451, %452 : vector<8x32xf32>
    %454 = tpu.concatenate %453, %453 in 1 : vector<8x32xf32>, vector<8x32xf32> -> vector<8x64xf32>
    %455 = arith.mulf %454, %9 : vector<8x64xf32>
    %456 = arith.truncf %455 : vector<8x64xf32> to vector<8x64xbf16>
    %cst_87 = arith.constant dense<0.000000e+00> : vector<8x128xf32>
    %457 = tpu.matmul %456, %317, %cst_87 {dimension_numbers = #tpu.dot_dimension_numbers<[1], [0], [0], [1], [0, 0, 1, 1], [], []>} : vector<8x64xbf16>, vector<64x128xbf16>, vector<8x128xf32> -> vector<8x128xf32>
    %458 = arith.addf %340, %457 : vector<8x128xf32>
    %459 = arith.negf %458 : vector<8x128xf32>
    %460 = math.exp %459 : vector<8x128xf32>
    %cst_88 = arith.constant 1.000000e+00 : f32
    %461 = vector.broadcast %cst_88 : f32 to vector<8x128xf32>
    %462 = arith.addf %461, %460 : vector<8x128xf32>
    %463 = arith.divf %461, %462 : vector<8x128xf32>
    %464 = vector.extract_strided_slice %463 {offsets = [0, 64], sizes = [8, 32], strides = [1, 1]} : vector<8x128xf32> to vector<8x32xf32>
    %cst_89 = arith.constant 2.000000e+00 : f32
    %465 = vector.broadcast %cst_89 : f32 to vector<8x32xf32>
    %466 = arith.mulf %465, %464 : vector<8x32xf32>
    %cst_90 = arith.constant 1.000000e+00 : f32
    %467 = vector.broadcast %cst_90 : f32 to vector<8x32xf32>
    %468 = arith.subf %466, %467 : vector<8x32xf32>
    %469 = vector.extract_strided_slice %463 {offsets = [0, 32], sizes = [8, 32], strides = [1, 1]} : vector<8x128xf32> to vector<8x32xf32>
    %470 = arith.mulf %469, %450 : vector<8x32xf32>
    %471 = vector.extract_strided_slice %463 {offsets = [0, 0], sizes = [8, 32], strides = [1, 1]} : vector<8x128xf32> to vector<8x32xf32>
    %472 = arith.mulf %471, %468 : vector<8x32xf32>
    %473 = arith.addf %470, %472 : vector<8x32xf32>
    %474 = vector.extract_strided_slice %463 {offsets = [0, 96], sizes = [8, 32], strides = [1, 1]} : vector<8x128xf32> to vector<8x32xf32>
    %475 = math.tanh %473 : vector<8x32xf32>
    %476 = arith.mulf %474, %475 : vector<8x32xf32>
    %477 = tpu.concatenate %476, %476 in 1 : vector<8x32xf32>, vector<8x32xf32> -> vector<8x64xf32>
    %478 = arith.mulf %477, %9 : vector<8x64xf32>
    %479 = arith.truncf %478 : vector<8x64xf32> to vector<8x64xbf16>
    %cst_91 = arith.constant dense<0.000000e+00> : vector<8x128xf32>
    %480 = tpu.matmul %479, %317, %cst_91 {dimension_numbers = #tpu.dot_dimension_numbers<[1], [0], [0], [1], [0, 0, 1, 1], [], []>} : vector<8x64xbf16>, vector<64x128xbf16>, vector<8x128xf32> -> vector<8x128xf32>
    %481 = arith.addf %343, %480 : vector<8x128xf32>
    %482 = arith.negf %481 : vector<8x128xf32>
    %483 = math.exp %482 : vector<8x128xf32>
    %cst_92 = arith.constant 1.000000e+00 : f32
    %484 = vector.broadcast %cst_92 : f32 to vector<8x128xf32>
    %485 = arith.addf %484, %483 : vector<8x128xf32>
    %486 = arith.divf %484, %485 : vector<8x128xf32>
    %487 = vector.extract_strided_slice %486 {offsets = [0, 64], sizes = [8, 32], strides = [1, 1]} : vector<8x128xf32> to vector<8x32xf32>
    %cst_93 = arith.constant 2.000000e+00 : f32
    %488 = vector.broadcast %cst_93 : f32 to vector<8x32xf32>
    %489 = arith.mulf %488, %487 : vector<8x32xf32>
    %cst_94 = arith.constant 1.000000e+00 : f32
    %490 = vector.broadcast %cst_94 : f32 to vector<8x32xf32>
    %491 = arith.subf %489, %490 : vector<8x32xf32>
    %492 = vector.extract_strided_slice %486 {offsets = [0, 32], sizes = [8, 32], strides = [1, 1]} : vector<8x128xf32> to vector<8x32xf32>
    %493 = arith.mulf %492, %473 : vector<8x32xf32>
    %494 = vector.extract_strided_slice %486 {offsets = [0, 0], sizes = [8, 32], strides = [1, 1]} : vector<8x128xf32> to vector<8x32xf32>
    %495 = arith.mulf %494, %491 : vector<8x32xf32>
    %496 = arith.addf %493, %495 : vector<8x32xf32>
    %497 = vector.extract_strided_slice %486 {offsets = [0, 96], sizes = [8, 32], strides = [1, 1]} : vector<8x128xf32> to vector<8x32xf32>
    %498 = math.tanh %496 : vector<8x32xf32>
    %499 = arith.mulf %497, %498 : vector<8x32xf32>
    %500 = tpu.concatenate %499, %499 in 1 : vector<8x32xf32>, vector<8x32xf32> -> vector<8x64xf32>
    %501 = arith.mulf %500, %9 : vector<8x64xf32>
    %502 = arith.truncf %501 : vector<8x64xf32> to vector<8x64xbf16>
    %cst_95 = arith.constant dense<0.000000e+00> : vector<8x128xf32>
    %503 = tpu.matmul %502, %317, %cst_95 {dimension_numbers = #tpu.dot_dimension_numbers<[1], [0], [0], [1], [0, 0, 1, 1], [], []>} : vector<8x64xbf16>, vector<64x128xbf16>, vector<8x128xf32> -> vector<8x128xf32>
    %504 = arith.addf %346, %503 : vector<8x128xf32>
    %505 = arith.negf %504 : vector<8x128xf32>
    %506 = math.exp %505 : vector<8x128xf32>
    %cst_96 = arith.constant 1.000000e+00 : f32
    %507 = vector.broadcast %cst_96 : f32 to vector<8x128xf32>
    %508 = arith.addf %507, %506 : vector<8x128xf32>
    %509 = arith.divf %507, %508 : vector<8x128xf32>
    %510 = vector.extract_strided_slice %509 {offsets = [0, 64], sizes = [8, 32], strides = [1, 1]} : vector<8x128xf32> to vector<8x32xf32>
    %cst_97 = arith.constant 2.000000e+00 : f32
    %511 = vector.broadcast %cst_97 : f32 to vector<8x32xf32>
    %512 = arith.mulf %511, %510 : vector<8x32xf32>
    %cst_98 = arith.constant 1.000000e+00 : f32
    %513 = vector.broadcast %cst_98 : f32 to vector<8x32xf32>
    %514 = arith.subf %512, %513 : vector<8x32xf32>
    %515 = vector.extract_strided_slice %509 {offsets = [0, 32], sizes = [8, 32], strides = [1, 1]} : vector<8x128xf32> to vector<8x32xf32>
    %516 = arith.mulf %515, %496 : vector<8x32xf32>
    %517 = vector.extract_strided_slice %509 {offsets = [0, 0], sizes = [8, 32], strides = [1, 1]} : vector<8x128xf32> to vector<8x32xf32>
    %518 = arith.mulf %517, %514 : vector<8x32xf32>
    %519 = arith.addf %516, %518 : vector<8x32xf32>
    %520 = vector.extract_strided_slice %509 {offsets = [0, 96], sizes = [8, 32], strides = [1, 1]} : vector<8x128xf32> to vector<8x32xf32>
    %521 = math.tanh %519 : vector<8x32xf32>
    %522 = arith.mulf %520, %521 : vector<8x32xf32>
    %523 = arith.addf %361, %384 : vector<8x32xf32>
    %524 = arith.maximumf %361, %384 : vector<8x32xf32>
    %525 = arith.addf %523, %407 : vector<8x32xf32>
    %526 = arith.maximumf %524, %407 : vector<8x32xf32>
    %527 = arith.addf %525, %430 : vector<8x32xf32>
    %528 = arith.maximumf %526, %430 : vector<8x32xf32>
    %529 = arith.addf %527, %453 : vector<8x32xf32>
    %530 = arith.maximumf %528, %453 : vector<8x32xf32>
    %531 = arith.addf %529, %476 : vector<8x32xf32>
    %532 = arith.maximumf %530, %476 : vector<8x32xf32>
    %533 = arith.addf %531, %499 : vector<8x32xf32>
    %534 = arith.maximumf %532, %499 : vector<8x32xf32>
    %535 = arith.addf %533, %522 : vector<8x32xf32>
    %536 = arith.maximumf %534, %522 : vector<8x32xf32>
    %cst_99 = arith.constant 1.250000e-01 : f32
    %537 = vector.broadcast %cst_99 : f32 to vector<8x32xf32>
    %538 = arith.mulf %535, %537 : vector<8x32xf32>
    %539 = vector.extract_strided_slice %538 {offsets = [0, 0], sizes = [2, 32], strides = [1, 1]} : vector<8x32xf32> to vector<2x32xf32>
    %540 = vector.extract_strided_slice %538 {offsets = [4, 0], sizes = [2, 32], strides = [1, 1]} : vector<8x32xf32> to vector<2x32xf32>
    %541 = tpu.concatenate %539, %540 in 1 : vector<2x32xf32>, vector<2x32xf32> -> vector<2x64xf32>
    %542 = vector.extract_strided_slice %536 {offsets = [0, 0], sizes = [2, 32], strides = [1, 1]} : vector<8x32xf32> to vector<2x32xf32>
    %543 = vector.extract_strided_slice %536 {offsets = [4, 0], sizes = [2, 32], strides = [1, 1]} : vector<8x32xf32> to vector<2x32xf32>
    %544 = tpu.concatenate %542, %543 in 1 : vector<2x32xf32>, vector<2x32xf32> -> vector<2x64xf32>
    %545 = vector.extract_strided_slice %538 {offsets = [2, 0], sizes = [2, 32], strides = [1, 1]} : vector<8x32xf32> to vector<2x32xf32>
    %546 = vector.extract_strided_slice %538 {offsets = [6, 0], sizes = [2, 32], strides = [1, 1]} : vector<8x32xf32> to vector<2x32xf32>
    %547 = tpu.concatenate %545, %546 in 1 : vector<2x32xf32>, vector<2x32xf32> -> vector<2x64xf32>
    %548 = vector.extract_strided_slice %536 {offsets = [2, 0], sizes = [2, 32], strides = [1, 1]} : vector<8x32xf32> to vector<2x32xf32>
    %549 = vector.extract_strided_slice %536 {offsets = [6, 0], sizes = [2, 32], strides = [1, 1]} : vector<8x32xf32> to vector<2x32xf32>
    %550 = tpu.concatenate %548, %549 in 1 : vector<2x32xf32>, vector<2x32xf32> -> vector<2x64xf32>
    %551 = tpu.concatenate %541, %544, %547, %550 in 1 : vector<2x64xf32>, vector<2x64xf32>, vector<2x64xf32>, vector<2x64xf32> -> vector<2x256xf32>
    %552 = arith.truncf %551 : vector<2x256xf32> to vector<2x256xbf16>
    %c0_100 = arith.constant 0 : index
    %c0_101 = arith.constant 0 : index
    %553 = vector.load %arg7[%c0_100, %c0_101] : memref<256x128xbf16, #tpu.memory_space<vmem>>, vector<256x128xbf16>
    %cst_102 = arith.constant dense<0.000000e+00> : vector<2x128xf32>
    %554 = tpu.matmul %552, %553, %cst_102 {dimension_numbers = #tpu.dot_dimension_numbers<[1], [0], [0], [1], [0, 0, 1, 1], [], []>} : vector<2x256xbf16>, vector<256x128xbf16>, vector<2x128xf32> -> vector<2x128xf32>
    %c0_103 = arith.constant 0 : index
    %c0_104 = arith.constant 0 : index
    %555 = vector.load %arg8[%c0_103, %c0_104] : memref<1x128xf32, #tpu.memory_space<vmem>>, vector<1x128xf32>
    %556 = vector.broadcast %555 : vector<1x128xf32> to vector<2x128xf32>
    %557 = arith.addf %554, %556 : vector<2x128xf32>
    %558 = math.tanh %557 : vector<2x128xf32>
    %559 = arith.truncf %558 : vector<2x128xf32> to vector<2x128xbf16>
    %c0_105 = arith.constant 0 : index
    %c0_106 = arith.constant 0 : index
    %560 = vector.load %arg9[%c0_105, %c0_106] : memref<128x128xbf16, #tpu.memory_space<vmem>>, vector<128x128xbf16>
    %cst_107 = arith.constant dense<0.000000e+00> : vector<2x128xf32>
    %561 = tpu.matmul %559, %560, %cst_107 {dimension_numbers = #tpu.dot_dimension_numbers<[1], [0], [0], [1], [0, 0, 1, 1], [], []>} : vector<2x128xbf16>, vector<128x128xbf16>, vector<2x128xf32> -> vector<2x128xf32>
    %c0_108 = arith.constant 0 : index
    %c0_109 = arith.constant 0 : index
    %562 = vector.load %arg10[%c0_108, %c0_109] : memref<1x128xf32, #tpu.memory_space<vmem>>, vector<1x128xf32>
    %563 = vector.broadcast %562 : vector<1x128xf32> to vector<2x128xf32>
    %564 = arith.addf %561, %563 : vector<2x128xf32>
    %565 = tpu.iota {dimensions = array<i32: 1>} : vector<2x128xi32>
    %c4_i32_110 = arith.constant 4 : i32
    %566 = vector.broadcast %c4_i32_110 : i32 to vector<2x128xi32>
    %567 = arith.cmpi slt, %565, %566 : vector<2x128xi32>
    %cst_111 = arith.constant -1.000000e+30 : f32
    %568 = vector.broadcast %cst_111 : f32 to vector<2x128xf32>
    %569 = arith.select %567, %564, %568 : vector<2x128xi1>, vector<2x128xf32>
    %cst_112 = arith.constant dense<0xFF800000> : vector<2xf32>
    %570 = vector.multi_reduction <maximumf>, %569, %cst_112 [1] : vector<2x128xf32> to vector<2xf32>
    %571 = vector.shape_cast %570 : vector<2xf32> to vector<2x1xf32>
    %572 = vector.broadcast %571 : vector<2x1xf32> to vector<2x128xf32>
    %573 = arith.subf %569, %572 : vector<2x128xf32>
    %574 = math.exp %573 : vector<2x128xf32>
    %cst_113 = arith.constant 0.000000e+00 : f32
    %575 = vector.broadcast %cst_113 : f32 to vector<2x128xf32>
    %576 = arith.select %567, %574, %575 : vector<2x128xi1>, vector<2x128xf32>
    %cst_114 = arith.constant dense<0.000000e+00> : vector<2xf32>
    %577 = vector.multi_reduction <add>, %576, %cst_114 [1] : vector<2x128xf32> to vector<2xf32>
    %578 = vector.shape_cast %577 : vector<2xf32> to vector<2x1xf32>
    %579 = vector.broadcast %578 : vector<2x1xf32> to vector<2x128xf32>
    %580 = arith.divf %576, %579 : vector<2x128xf32>
    %c0_115 = arith.constant 0 : index
    %c0_116 = arith.constant 0 : index
    %581 = vector.load %arg11[%c0_115, %c0_116] : memref<2x128xf32, #tpu.memory_space<vmem>>, vector<2x128xf32>
    tpu.vector_store %arg11[%c0_115, %c0_116], %580 {strides = array<i32>} : memref<2x128xf32, #tpu.memory_space<vmem>>, vector<2x128xf32>,
    return
  }
}

</mosaic_0001>

<bundles_post_ra>
// kernel: esim_forward.1
= control target key start
LH: loop header
LB: loop body
LE: loop exit
PB: predicated region body
PF: predicated region fallthrough
CT: control target
= control target key end

     0   :  { %v3153_v2 = vmov 0   ;;  %v3154_v4 = vmov 0.0   ;;  %vm100_vm0 = vcmask 261120   ;;  %s4013_s0 = inlined_call_operand.vmem [shape: f32[32,32], index: 0, kind: input, shape index: {}]   ;;  %s4014_s1 = inlined_call_operand.vmem [shape: bf16[32,256], index: 1, kind: input, shape index: {}]   ;;  %s4015_s2 = inlined_call_operand.vmem [shape: bf16[64,128], index: 2, kind: input, shape index: {}]   ;;  %s4016_s3 = inlined_call_operand.vmem [shape: f32[1,256], index: 3, kind: input, shape index: {}]   ;;  %s4017_s4 = inlined_call_operand.vmem [shape: bf16[256,256], index: 4, kind: input, shape index: {}]   ;;  %s4018_s5 = inlined_call_operand.vmem [shape: bf16[64,128], index: 5, kind: input, shape index: {}]   ;;  %s4019_s6 = inlined_call_operand.vmem [shape: f32[1,256], index: 6, kind: input, shape index: {}]   ;;  %s4020_s7 = inlined_call_operand.vmem [shape: bf16[256,128], index: 7, kind: input, shape index: {}]   ;;  %s4021_s8 = inlined_call_operand.vmem [shape: f32[1,128], index: 8, kind: input, shape index: {}]   ;;  %s4022_s9 = inlined_call_operand.vmem [shape: bf16[128,128], index: 9, kind: input, shape index: {}]   ;;  %s4023_s10 = inlined_call_operand.vmem [shape: f32[1,128], index: 10, kind: input, shape index: {}]   ;;  %s4024_s11 = inlined_call_operand.hbm [shape: f32[2,128], index: 11, kind: output, shape index: {}]  }
   0x1   :  { %v2925_v0 = vld [vmem:[%s4014_s1 + $0x4] ss:$8 sps:$4 sm:$0xff]   ;;  %v2927_v1 = vld [vmem:[%s4014_s1] ss:$8 sps:$4 sm:$0xff]   ;;  %139 = vmatprep.mubr.bf16.mxu1 %v3153_v2  ;;  %v2928_v3 = vld [vmem:[%s4014_s1 + $0x14] ss:$8 sps:$4 sm:$0xff]   ;;  %2698 = vmatprep.subr.bf16.mxu0 %v3154_v4 }
   0x2   :  { %107 = vmatprep.subr.bf16.mxu1 %v2925_v0  ;;  %v2930_v5 = vld [vmem:[%s4014_s1 + $0x10] ss:$8 sps:$4 sm:$0xff]   ;;  %v50_v6 = vld [vmem:[%s4013_s0] sm:$0xff]  ;;  %v51_v7 = vld [vmem:[%s4013_s0 + $0x8] sm:$0xff] }
   0x3   :  { %108 = vmatpush1.bf16.msra.mxu1 %v2927_v1  ;;  %v67_v8 = vpack.c.bf16 %v51_v7, %v50_v6  ;;  %v52_v9 = vld [vmem:[%s4013_s0 + $0x10] sm:$0xff]  ;;  %v53_v10 = vld [vmem:[%s4013_s0 + $0x18] sm:$0xff] }
   0x4   :  { %109 = vmatprep.subr.bf16.mxu1 %v2928_v3  ;;  %v68_v11 = vpack.c.bf16 %v53_v10, %v52_v9 }
   0x7   :  { %110 = vmatpush1.bf16.msra.mxu1 %v2930_v5 }
   0x8   :  { %2686 = vmatprep.subr.bf16.mxu1 %v3154_v4 }
   0xa   :  { %2459 = vmatmul.mubr.msk.bf16.vlgmr.msra.gmra.mrb[0].mxu1 %vm100_vm0, %v67_v8 }
   0xb   :  { %149 = vmatprep.mubr.bf16.mxu1 %v3153_v2 }
  0x12   :  { %2460 = vmatmul.mubr.msk.bf16.gmra.mrb[4].mxu1 %vm100_vm0, %v68_v11 }
  0x13   :  { %16 = vsyncpa [#allocation3], 0  ;;  %v40_v12 = vlaneseq  ;;  %v66_v15 = vld [vmem:[%s4016_s3] sm:$0x3]  ;;  %vm160_vm1 = vcmask 1043456   ;;  %s3155_s0 = smov 64  }
  0x14   :  { %v3287_v59 = vld [vmem:[%s4015_s2] sm:$0xff]   ;;  %v3293_v61 = vld [vmem:[%s4015_s2 + $0x8] sm:$0xff]   ;;  %s3156_s18 = smov 96   ;;  %v3306_v62 = vld [vmem:[%s4015_s2 + $0x10] sm:$0xff]   ;;  %vm3157_vm2 = vmmov 0   ;;  %vm3159_vm6 = vmmov 1  }
  0x15   :  { %v3250_v13 = vshrl.u32 %v40_v12, 7  ;;  %2687 = vmatpush3.bf16.msra.mxu1 %v3287_v59  ;;  %2699 = vmatpush3.bf16.msra.mxu0 %v3287_v59  ;;  %v3315_v63 = vld [vmem:[%s4015_s2 + $0x18] sm:$0xff]   ;;  %s3158_s2 = smov 32   ;;  %v3333_v2 = vand.u32 127, %v40_v12  ;;  %vm246_vm8 = vcmask 523264  }
  0x16   :  { %2688 = vmatprep.subr.bf16.mxu1 %v3154_v4  ;;  %2700 = vmatprep.subr.bf16.mxu0 %v3154_v4 }
  0x17   :  { %v76_v14 = vsub.s32 1, %v3250_v13  ;;  %v72_v16 = vsub.s32 0, %v3250_v13  ;;  %2694 = vmatprep.mubr.msk.bf16.mxu1 %vm3157_vm2, %v3154_v4  ;;  %2706 = vmatprep.mubr.msk.bf16.mxu0 %vm3157_vm2, %v3154_v4  ;;  %vm44_vm3 = vcmp.lt.s32.totalorder %v3250_v13, 4  ;;  %vm45_vm4 = vcmp.lt.s32.totalorder %v3333_v2, 32 }
  0x18   :  { %vm46_vm5 = vmxor %vm44_vm3, %vm45_vm4 }
  0x19   :  { %v77_v17 = vrot.slane %v66_v15, %v76_v14  ;;  %v73_v19 = vrot.slane %v66_v15, %v72_v16  ;;  %2689 = vmatpush3.bf16.msra.mxu1 %v3293_v61  ;;  %2701 = vmatpush3.bf16.msra.mxu0 %v3293_v61  ;;  %vm47_vm7 = vmxor %vm46_vm5, %vm3159_vm6 }
  0x1a   :  { %2690 = vmatprep.subr.bf16.mxu1 %v3154_v4  ;;  %2702 = vmatprep.subr.bf16.mxu0 %v3154_v4  ;;  %v3340_v5 = vsel %vm47_vm7, 1.0, %v3154_v4 }
  0x1d   :  { %2691 = vmatpush3.bf16.msra.mxu1 %v3306_v62  ;;  %2703 = vmatpush3.bf16.msra.mxu0 %v3306_v62 }
  0x1e   :  { %2692 = vmatprep.subr.bf16.mxu1 %v3154_v4  ;;  %2704 = vmatprep.subr.bf16.mxu0 %v3154_v4 }
  0x21   :  { %2693 = vmatpush3.bf16.msra.mxu1 %v3315_v63  ;;  %2705 = vmatpush3.bf16.msra.mxu0 %v3315_v63 }
  0x22   :  { %2710 = vmatprep.subr.bf16.mxu1 %v3154_v4  ;;  %2722 = vmatprep.subr.bf16.mxu0 %v3154_v4 }
  0xdd   :  { %v141_v18 = vpop.f32.mrb[0].mxu1 }
  0xde   :  { %v143_v20 = vpop.f32.mrb[1].mxu1  ;;  %v142_v29 = vadd.f32 %v141_v18, %v73_v19 }
  0xdf   :  { %v144_v21 = vadd.f32 %v143_v20, %v77_v17  ;;  %v145_v22 = vpop.f32.mrb[2].mxu1 }
  0xe0   :  { %v146_v23 = vadd.f32 %v145_v22, %v73_v19  ;;  %v147_v24 = vpop.f32.mrb[3].mxu1  ;;  %v163_v45 = vrot.slane %v142_v29, 4 }
  0xe1   :  { %v148_v25 = vadd.f32 %v147_v24, %v77_v17  ;;  %v190_v41 = vrot.slane %v144_v21, 4 }
  0xe2   :  { %v171_v37 = vrot.slane %v146_v23, 4 }
  0xe3   :  { %v182_v32 = vrot.slane %v148_v25, 4 }
  0xe5   :  { %v151_v26 = vpop.f32.mrb[4].mxu1 }
  0xe6   :  { %v152_v27 = vadd.f32 %v151_v26, %v73_v19  ;;  %v153_v28 = vpop.f32.mrb[5].mxu1 }
  0xe7   :  { %v154_v30 = vadd.f32 %v153_v28, %v77_v17  ;;  %v155_v31 = vpop.f32.mrb[6].mxu1 }
  0xe8   :  { %v179_v33 = vrot.slane %v152_v27, 4  ;;  %v156_v34 = vadd.f32 %v155_v31, %v73_v19  ;;  %v157_v35 = vpop.f32.mrb[7].mxu1  ;;  %v3262_v36 = vsel %vm160_vm1, %v152_v27, %v148_v25 }
  0xe9   :  { %v174_v38 = vrot.slane %v154_v30, 4  ;;  %v158_v39 = vadd.f32 %v157_v35, %v77_v17  ;;  %v3265_v40 = vsel %vm160_vm1, %v146_v23, %v154_v30 }
  0xea   :  { %v187_v42 = vrot.slane %v156_v34, 4  ;;  %v3268_v43 = vsel %vm160_vm1, %v179_v33, %v182_v32  ;;  %v3271_v44 = vsel %vm160_vm1, %v156_v34, %v144_v21 }
  0xeb   :  { %v161_v46 = vsel %vm160_vm1, %v142_v29, %v158_v39  ;;  %v166_v47 = vrot.slane %v158_v39, 4  ;;  %v3275_v48 = vsel %vm160_vm1, %v171_v37, %v174_v38 }
  0xec   :  { %v2461_v49 = vmul.f32 -1.442695, %v161_v46  ;;  %v3278_v50 = vsel %vm160_vm1, %v187_v42, %v190_v41 }
  0xed   :  { %v3281_v51 = vsel %vm160_vm1, %v163_v45, %v166_v47 }
  0xee   :  { %3011 = vpow2.f32 %v2461_v49 }
  0xf8   :  { %v3012_v52 = vpop.eup %3011 }
  0xf9   :  { %v196_v53 = vadd.f32 1.0, %v3012_v52 }
  0xfb   :  { %3013 = vrcp.f32 %v196_v53 }
 0x105   :  { %v3014_v54 = vpop.eup %3013 }
 0x106   :  { %v199_v55 = vmul.f32 2.0, %v3014_v54 }
 0x108   :  { %v2462_v56 = vadd.f32 -1.0, %v199_v55 }
 0x10a   :  { %202 = vrot.lane.b32.xlu0 %v2462_v56, %s3155_s0 }
 0x17c   :  { %v203_v57 = vpop.permute.xlu0 %202 }
 0x17d   :  { %v205_v58 = vmul.f32 %v3014_v54, %v203_v57 }
 0x17f   :  { %3015 = vtanh.f32 %v205_v58 }
 0x189   :  { %v3016_v60 = vpop.eup %3015 }
 0x18a   :  { %208 = vrot.lane.b32.xlu0 %v3016_v60, %s3156_s18 }
 0x1fc   :  { %v209_v0 = vpop.permute.xlu0 %208 }
 0x1fd   :  { %v3325_v1 = vmul.f32 %v3014_v54, %v209_v0 }
 0x1ff   :  { %213 = vrot.lane.b32.xlu1 %v3325_v1, %s3158_s2 }
 0x203   :  { %216 = vrot.lane.b32.xlu1 %v3325_v1, %s3155_s0 }
 0x207   :  { %300 = vrot.lane.b32.xlu1 %v205_v58, %s3158_s2 }
 0x271   :  { %v3337_v3 = vpop.permute.xlu1 %213 }
 0x275   :  { %v217_v6 = vpop.permute.xlu1 %216 }
 0x276   :  { %v219_v7 = vsel %vm100_vm0, %v3337_v3, %v217_v6 }
 0x277   :  { %v220_v8 = vmul.f32 %v3340_v5, %v219_v7 }
 0x279   :  { %v221_v9 = vpack.c.bf16 %v220_v8, %v220_v8  ;;  %v301_v26 = vpop.permute.xlu1 %300 }
 0x27b   :  { %2695 = vmatmul.mubr.msk.bf16.vlgmr.msra.gmra.mrb[8].mxu1 %vm246_vm8, %v221_v9 }
 0x27c   :  { %2711 = vmatpush3.bf16.msra.mxu1 %v3287_v59  ;;  %2718 = vmatprep.mubr.msk.bf16.mxu1 %vm3157_vm2, %v3154_v4 }
 0x27d   :  { %2712 = vmatprep.subr.bf16.mxu1 %v3154_v4 }
 0x280   :  { %2713 = vmatpush3.bf16.msra.mxu1 %v3293_v61 }
 0x281   :  { %2714 = vmatprep.subr.bf16.mxu1 %v3154_v4 }
 0x284   :  { %2715 = vmatpush3.bf16.msra.mxu1 %v3306_v62 }
 0x285   :  { %2716 = vmatprep.subr.bf16.mxu1 %v3154_v4 }
 0x288   :  { %2717 = vmatpush3.bf16.msra.mxu1 %v3315_v63 }
 0x289   :  { %2734 = vmatprep.subr.bf16.mxu1 %v3154_v4 }
 0x34e   :  { %v284_v10 = vpop.f32.mrb[8].mxu1 }
 0x34f   :  { %v290_v11 = vadd.f32 %v284_v10, %v3281_v51  ;;  %v2696_v12 = vpop.f32.mrb[9].mxu1 }
 0x350   :  { %v287_v15 = vpop.f32.mrb[10].mxu1 }
 0x351   :  { %v2468_v17 = vmul.f32 -1.442695, %v290_v11  ;;  %v2697_v18 = vpop.f32.mrb[11].mxu1 }
 0x353   :  { %3017 = vpow2.f32 %v2468_v17 }
 0x35d   :  { %v3018_v19 = vpop.eup %3017 }
 0x35e   :  { %v294_v20 = vadd.f32 1.0, %v3018_v19 }
 0x360   :  { %3019 = vrcp.f32 %v294_v20 }
 0x36a   :  { %v3020_v21 = vpop.eup %3019 }
 0x36b   :  { %v297_v22 = vmul.f32 2.0, %v3020_v21  ;;  %v303_v27 = vmul.f32 %v3020_v21, %v301_v26 }
 0x36d   :  { %v2469_v23 = vadd.f32 -1.0, %v297_v22 }
 0x36f   :  { %305 = vrot.lane.b32.xlu0 %v2469_v23, %s3155_s0 }
 0x3e1   :  { %v306_v24 = vpop.permute.xlu0 %305 }
 0x3e2   :  { %v308_v25 = vmul.f32 %v3020_v21, %v306_v24 }
 0x3e4   :  { %310 = vrot.lane.b32.xlu0 %v308_v25, %s3158_s2 }
 0x456   :  { %v311_v28 = vpop.permute.xlu0 %310 }
 0x457   :  { %v313_v29 = vadd.f32 %v311_v28, %v303_v27 }
 0x459   :  { %3021 = vtanh.f32 %v313_v29 }
 0x463   :  { %v3022_v30 = vpop.eup %3021 }
 0x464   :  { %316 = vrot.lane.b32.xlu1 %v3022_v30, %s3155_s0 }
 0x4d6   :  { %v317_v31 = vpop.permute.xlu1 %316 }
 0x4d7   :  { %v3360_v32 = vmul.f32 %v3020_v21, %v317_v31 }
 0x4d9   :  { %324 = vrot.lane.b32.xlu1 %v3360_v32, %s3155_s0  ;;  %321 = vrot.lane.b32.xlu0 %v3360_v32, %s3158_s2 }
 0x54b   :  { %v325_v33 = vpop.permute.xlu1 %324  ;;  %v3366_v34 = vpop.permute.xlu0 %321 }
 0x54c   :  { %v327_v35 = vsel %vm100_vm0, %v3366_v34, %v325_v33 }
 0x54d   :  { %v328_v37 = vmul.f32 %v3340_v5, %v327_v35 }
 0x54f   :  { %v329_v38 = vpack.c.bf16 %v328_v37, %v328_v37 }
 0x551   :  { %2707 = vmatmul.mubr.msk.bf16.vlgmr.msra.gmra.mrb[0].mxu0 %vm246_vm8, %v329_v38 }
 0x552   :  { %2723 = vmatpush3.bf16.msra.mxu0 %v3287_v59  ;;  %2730 = vmatprep.mubr.msk.bf16.mxu0 %vm3157_vm2, %v3154_v4 }
 0x553   :  { %2724 = vmatprep.subr.bf16.mxu0 %v3154_v4 }
 0x556   :  { %2725 = vmatpush3.bf16.msra.mxu0 %v3293_v61 }
 0x557   :  { %2726 = vmatprep.subr.bf16.mxu0 %v3154_v4 }
 0x55a   :  { %2727 = vmatpush3.bf16.msra.mxu0 %v3306_v62 }
 0x55b   :  { %2728 = vmatprep.subr.bf16.mxu0 %v3154_v4 }
 0x55e   :  { %2729 = vmatpush3.bf16.msra.mxu0 %v3315_v63 }
 0x55f   :  { %2746 = vmatprep.subr.bf16.mxu0 %v3154_v4 }
 0x624   :  { %v367_v39 = vpop.f32.mrb[0].mxu0 }
 0x625   :  { %v373_v41 = vadd.f32 %v367_v39, %v3265_v40  ;;  %v2708_v42 = vpop.f32.mrb[1].mxu0 }
 0x626   :  { %v370_v45 = vpop.f32.mrb[2].mxu0 }
 0x627   :  { %v2471_v46 = vmul.f32 -1.442695, %v373_v41  ;;  %v2709_v47 = vpop.f32.mrb[3].mxu0 }
 0x629   :  { %3023 = vpow2.f32 %v2471_v46 }
 0x633   :  { %v3024_v49 = vpop.eup %3023 }
 0x634   :  { %v377_v51 = vadd.f32 1.0, %v3024_v49 }
 0x636   :  { %3025 = vrcp.f32 %v377_v51 }
 0x640   :  { %v3026_v52 = vpop.eup %3025 }
 0x641   :  { %v380_v53 = vmul.f32 2.0, %v3026_v52  ;;  %v382_v57 = vmul.f32 %v3026_v52, %v313_v29 }
 0x643   :  { %v2472_v54 = vadd.f32 -1.0, %v380_v53 }
 0x645   :  { %384 = vrot.lane.b32.xlu0 %v2472_v54, %s3155_s0 }
 0x6b7   :  { %v385_v55 = vpop.permute.xlu0 %384 }
 0x6b8   :  { %v387_v56 = vmul.f32 %v3026_v52, %v385_v55 }
 0x6ba   :  { %389 = vrot.lane.b32.xlu1 %v387_v56, %s3158_s2 }
 0x72c   :  { %v390_v58 = vpop.permute.xlu1 %389 }
 0x72d   :  { %v392_v40 = vadd.f32 %v390_v58, %v382_v57 }
 0x72f   :  { %3027 = vtanh.f32 %v392_v40 }
 0x739   :  { %v3028_v60 = vpop.eup %3027 }
 0x73a   :  { %395 = vrot.lane.b32.xlu0 %v3028_v60, %s3155_s0 }
 0x7ac   :  { %v396_v0 = vpop.permute.xlu0 %395 }
 0x7ad   :  { %v3386_v6 = vmul.f32 %v3026_v52, %v396_v0 }
 0x7af   :  { %403 = vrot.lane.b32.xlu0 %v3386_v6, %s3155_s0  ;;  %400 = vrot.lane.b32.xlu1 %v3386_v6, %s3158_s2 }
 0x821   :  { %v404_v7 = vpop.permute.xlu0 %403  ;;  %v3392_v8 = vpop.permute.xlu1 %400 }
 0x822   :  { %v406_v9 = vsel %vm100_vm0, %v3392_v8, %v404_v7 }
 0x823   :  { %v407_v10 = vmul.f32 %v3340_v5, %v406_v9 }
 0x825   :  { %v408_v11 = vpack.c.bf16 %v407_v10, %v407_v10 }
 0x827   :  { %2719 = vmatmul.mubr.msk.bf16.vlgmr.msra.gmra.mrb[12].mxu1 %vm246_vm8, %v408_v11 }
 0x828   :  { %2735 = vmatpush3.bf16.msra.mxu1 %v3287_v59  ;;  %2742 = vmatprep.mubr.msk.bf16.mxu1 %vm3157_vm2, %v3154_v4 }
 0x829   :  { %2736 = vmatprep.subr.bf16.mxu1 %v3154_v4 }
 0x82c   :  { %2737 = vmatpush3.bf16.msra.mxu1 %v3293_v61 }
 0x82d   :  { %2738 = vmatprep.subr.bf16.mxu1 %v3154_v4 }
 0x830   :  { %2739 = vmatpush3.bf16.msra.mxu1 %v3306_v62 }
 0x831   :  { %2740 = vmatprep.subr.bf16.mxu1 %v3154_v4 }
 0x834   :  { %2741 = vmatpush3.bf16.msra.mxu1 %v3315_v63 }
 0x835   :  { %2758 = vmatprep.subr.bf16.mxu1 %v3154_v4 }
 0x8fa   :  { %v446_v12 = vpop.f32.mrb[12].mxu1 }
 0x8fb   :  { %v452_v15 = vadd.f32 %v446_v12, %v3275_v48  ;;  %v2720_v17 = vpop.f32.mrb[13].mxu1 }
 0x8fc   :  { %v449_v18 = vpop.f32.mrb[14].mxu1 }
 0x8fd   :  { %v2474_v19 = vmul.f32 -1.442695, %v452_v15  ;;  %v2721_v20 = vpop.f32.mrb[15].mxu1 }
 0x8ff   :  { %3029 = vpow2.f32 %v2474_v19 }
 0x909   :  { %v3030_v21 = vpop.eup %3029 }
 0x90a   :  { %v456_v22 = vadd.f32 1.0, %v3030_v21 }
 0x90c   :  { %3031 = vrcp.f32 %v456_v22 }
 0x916   :  { %v3032_v23 = vpop.eup %3031 }
 0x917   :  { %v459_v24 = vmul.f32 2.0, %v3032_v23  ;;  %v461_v28 = vmul.f32 %v3032_v23, %v392_v40 }
 0x919   :  { %v2475_v25 = vadd.f32 -1.0, %v459_v24 }
 0x91b   :  { %463 = vrot.lane.b32.xlu1 %v2475_v25, %s3155_s0 }
 0x98d   :  { %v464_v26 = vpop.permute.xlu1 %463 }
 0x98e   :  { %v466_v27 = vmul.f32 %v3032_v23, %v464_v26 }
 0x990   :  { %468 = vrot.lane.b32.xlu0 %v466_v27, %s3158_s2 }
 0xa02   :  { %v469_v29 = vpop.permute.xlu0 %468 }
 0xa03   :  { %v471_v48 = vadd.f32 %v469_v29, %v461_v28 }
 0xa05   :  { %3033 = vtanh.f32 %v471_v48 }
 0xa0f   :  { %v3034_v30 = vpop.eup %3033 }
 0xa10   :  { %474 = vrot.lane.b32.xlu1 %v3034_v30, %s3155_s0 }
 0xa82   :  { %v475_v31 = vpop.permute.xlu1 %474 }
 0xa83   :  { %v3412_v33 = vmul.f32 %v3032_v23, %v475_v31 }
 0xa85   :  { %482 = vrot.lane.b32.xlu1 %v3412_v33, %s3155_s0  ;;  %479 = vrot.lane.b32.xlu0 %v3412_v33, %s3158_s2 }
 0xaf7   :  { %v483_v35 = vpop.permute.xlu1 %482  ;;  %v3418_v37 = vpop.permute.xlu0 %479 }
 0xaf8   :  { %v485_v38 = vsel %vm100_vm0, %v3418_v37, %v483_v35 }
 0xaf9   :  { %v486_v39 = vmul.f32 %v3340_v5, %v485_v38 }
 0xafb   :  { %v487_v41 = vpack.c.bf16 %v486_v39, %v486_v39 }
 0xafd   :  { %2731 = vmatmul.mubr.msk.bf16.vlgmr.msra.gmra.mrb[4].mxu0 %vm246_vm8, %v487_v41 }
 0xafe   :  { %2747 = vmatpush3.bf16.msra.mxu0 %v3287_v59  ;;  %2754 = vmatprep.mubr.msk.bf16.mxu0 %vm3157_vm2, %v3154_v4 }
 0xaff   :  { %2748 = vmatprep.subr.bf16.mxu0 %v3154_v4 }
 0xb02   :  { %2749 = vmatpush3.bf16.msra.mxu0 %v3293_v61 }
 0xb03   :  { %2750 = vmatprep.subr.bf16.mxu0 %v3154_v4 }
 0xb06   :  { %2751 = vmatpush3.bf16.msra.mxu0 %v3306_v62 }
 0xb07   :  { %2752 = vmatprep.subr.bf16.mxu0 %v3154_v4 }
 0xb0a   :  { %2753 = vmatpush3.bf16.msra.mxu0 %v3315_v63 }
 0xbd0   :  { %v525_v42 = vpop.f32.mrb[4].mxu0 }
 0xbd1   :  { %v531_v45 = vadd.f32 %v525_v42, %v3262_v36  ;;  %v2732_v46 = vpop.f32.mrb[5].mxu0 }
 0xbd2   :  { %v528_v47 = vpop.f32.mrb[6].mxu0 }
 0xbd3   :  { %v2477_v49 = vmul.f32 -1.442695, %v531_v45  ;;  %v2733_v51 = vpop.f32.mrb[7].mxu0 }
 0xbd5   :  { %3035 = vpow2.f32 %v2477_v49 }
 0xbdf   :  { %v3036_v52 = vpop.eup %3035 }
 0xbe0   :  { %v535_v53 = vadd.f32 1.0, %v3036_v52 }
 0xbe2   :  { %3037 = vrcp.f32 %v535_v53 }
 0xbec   :  { %v3038_v54 = vpop.eup %3037 }
 0xbed   :  { %v538_v55 = vmul.f32 2.0, %v3038_v54  ;;  %v540_v40 = vmul.f32 %v3038_v54, %v471_v48 }
 0xbef   :  { %v2478_v56 = vadd.f32 -1.0, %v538_v55 }
 0xbf1   :  { %542 = vrot.lane.b32.xlu0 %v2478_v56, %s3155_s0 }
 0xc63   :  { %v543_v57 = vpop.permute.xlu0 %542 }
 0xc64   :  { %v545_v58 = vmul.f32 %v3038_v54, %v543_v57 }
 0xc66   :  { %547 = vrot.lane.b32.xlu1 %v545_v58, %s3158_s2 }
 0xcd8   :  { %v548_v60 = vpop.permute.xlu1 %547 }
 0xcd9   :  { %v550_v36 = vadd.f32 %v548_v60, %v540_v40 }
 0xcdb   :  { %3039 = vtanh.f32 %v550_v36 }
 0xce5   :  { %v3040_v0 = vpop.eup %3039 }
 0xce6   :  { %553 = vrot.lane.b32.xlu0 %v3040_v0, %s3155_s0 }
 0xd58   :  { %v554_v7 = vpop.permute.xlu0 %553 }
 0xd59   :  { %v3437_v9 = vmul.f32 %v3038_v54, %v554_v7 }
 0xd5b   :  { %561 = vrot.lane.b32.xlu0 %v3437_v9, %s3155_s0  ;;  %558 = vrot.lane.b32.xlu1 %v3437_v9, %s3158_s2 }
 0xdcd   :  { %v562_v10 = vpop.permute.xlu0 %561  ;;  %v3443_v11 = vpop.permute.xlu1 %558 }
 0xdce   :  { %v564_v12 = vsel %vm100_vm0, %v3443_v11, %v562_v10 }
 0xdcf   :  { %v565_v15 = vmul.f32 %v3340_v5, %v564_v12 }
 0xdd1   :  { %v566_v17 = vpack.c.bf16 %v565_v15, %v565_v15 }
 0xdd3   :  { %2743 = vmatmul.mubr.msk.bf16.vlgmr.msra.gmra.mrb[16].mxu1 %vm246_vm8, %v566_v17 }
 0xdd4   :  { %2759 = vmatpush3.bf16.msra.mxu1 %v3287_v59  ;;  %2766 = vmatprep.mubr.msk.bf16.mxu1 %vm3157_vm2, %v3154_v4 }
 0xdd5   :  { %2760 = vmatprep.subr.bf16.mxu1 %v3154_v4 }
 0xdd8   :  { %2761 = vmatpush3.bf16.msra.mxu1 %v3293_v61 }
 0xdd9   :  { %2762 = vmatprep.subr.bf16.mxu1 %v3154_v4 }
 0xddc   :  { %2763 = vmatpush3.bf16.msra.mxu1 %v3306_v62 }
 0xddd   :  { %2764 = vmatprep.subr.bf16.mxu1 %v3154_v4 }
 0xde0   :  { %2765 = vmatpush3.bf16.msra.mxu1 %v3315_v63 }
 0xea6   :  { %v604_v18 = vpop.f32.mrb[16].mxu1 }
 0xea7   :  { %v610_v19 = vadd.f32 %v604_v18, %v3268_v43  ;;  %v2744_v20 = vpop.f32.mrb[17].mxu1 }
 0xea8   :  { %v607_v59 = vpop.f32.mrb[18].mxu1 }
 0xea9   :  { %v2480_v21 = vmul.f32 -1.442695, %v610_v19  ;;  %v2745_v22 = vpop.f32.mrb[19].mxu1 }
 0xeab   :  { %3041 = vpow2.f32 %v2480_v21 }
 0xeb5   :  { %v3042_v23 = vpop.eup %3041 }
 0xeb6   :  { %v614_v24 = vadd.f32 1.0, %v3042_v23 }
 0xeb8   :  { %3043 = vrcp.f32 %v614_v24 }
 0xec2   :  { %v3044_v61 = vpop.eup %3043 }
 0xec3   :  { %v617_v25 = vmul.f32 2.0, %v3044_v61  ;;  %v619_v63 = vmul.f32 %v3044_v61, %v550_v36 }
 0xec5   :  { %v2481_v26 = vadd.f32 -1.0, %v617_v25 }
 0xec7   :  { %621 = vrot.lane.b32.xlu1 %v2481_v26, %s3155_s0 }
 0xf39   :  { %v622_v62 = vpop.permute.xlu1 %621 }
 0xf3a   :  { %v624_v27 = vmul.f32 %v3044_v61, %v622_v62 }
 0xf3c   :  { %626 = vrot.lane.b32.xlu0 %v624_v27, %s3158_s2 }
 0xfae   :  { %v627_v28 = vpop.permute.xlu0 %626 }
 0xfaf   :  { %v629_v43 = vadd.f32 %v627_v28, %v619_v63 }
 0xfb1   :  { %3045 = vtanh.f32 %v629_v43 }
 0xfbb   :  { %v3046_v29 = vpop.eup %3045 }
 0xfbc   :  { %632 = vrot.lane.b32.xlu1 %v3046_v29, %s3155_s0 }
0x102e   :  { %v633_v48 = vpop.permute.xlu1 %632 }
0x102f   :  { %v3462_v30 = vmul.f32 %v3044_v61, %v633_v48 }
0x1031   :  { %640 = vrot.lane.b32.xlu1 %v3462_v30, %s3155_s0  ;;  %637 = vrot.lane.b32.xlu0 %v3462_v30, %s3158_s2 }
0x10a3   :  { %v641_v31 = vpop.permute.xlu1 %640  ;;  %v3468_v35 = vpop.permute.xlu0 %637 }
0x10a4   :  { %v643_v38 = vsel %vm100_vm0, %v3468_v35, %v641_v31 }
0x10a5   :  { %v644_v39 = vmul.f32 %v3340_v5, %v643_v38  ;;  %v810_v38 = vrot.slane %v3437_v9, 4  ;;  %v825_v9 = vrot.slane %v3360_v32, 4 }
0x10a7   :  { %v645_v41 = vpack.c.bf16 %v644_v39, %v644_v39  ;;  %v805_v39 = vrot.slane %v3462_v30, 4 }
0x10a9   :  { %2755 = vmatmul.mubr.msk.bf16.vlgmr.msra.gmra.mrb[8].mxu0 %vm246_vm8, %v645_v41 }
0x117c   :  { %v683_v42 = vpop.f32.mrb[8].mxu0 }
0x117d   :  { %v689_v45 = vadd.f32 %v683_v42, %v3271_v44  ;;  %v2756_v46 = vpop.f32.mrb[9].mxu0 }
0x117e   :  { %v686_v47 = vpop.f32.mrb[10].mxu0  ;;  %v833_v46 = vrot.slane %v3325_v1, 4 }
0x117f   :  { %v2483_v49 = vmul.f32 -1.442695, %v689_v45  ;;  %v2757_v51 = vpop.f32.mrb[11].mxu0  ;;  %v815_v45 = vrot.slane %v3412_v33, 4 }
0x1181   :  { %3047 = vpow2.f32 %v2483_v49 }
0x118b   :  { %v3048_v52 = vpop.eup %3047 }
0x118c   :  { %v693_v53 = vadd.f32 1.0, %v3048_v52 }
0x118e   :  { %3049 = vrcp.f32 %v693_v53 }
0x1198   :  { %v3050_v54 = vpop.eup %3049 }
0x1199   :  { %v696_v55 = vmul.f32 2.0, %v3050_v54  ;;  %v698_v40 = vmul.f32 %v3050_v54, %v629_v43 }
0x119b   :  { %v2484_v56 = vadd.f32 -1.0, %v696_v55 }
0x119d   :  { %700 = vrot.lane.b32.xlu0 %v2484_v56, %s3155_s0 }
0x120f   :  { %v701_v57 = vpop.permute.xlu0 %700 }
0x1210   :  { %v703_v58 = vmul.f32 %v3050_v54, %v701_v57 }
0x1212   :  { %705 = vrot.lane.b32.xlu1 %v703_v58, %s3158_s2 }
0x1284   :  { %v706_v60 = vpop.permute.xlu1 %705 }
0x1285   :  { %v708_v44 = vadd.f32 %v706_v60, %v698_v40 }
0x1287   :  { %3051 = vtanh.f32 %v708_v44 }
0x1291   :  { %v3052_v36 = vpop.eup %3051 }
0x1292   :  { %711 = vrot.lane.b32.xlu0 %v3052_v36, %s3155_s0 }
0x1304   :  { %v712_v0 = vpop.permute.xlu0 %711 }
0x1305   :  { %v714_v7 = vmul.f32 %v3050_v54, %v712_v0 }
0x1307   :  { %719 = vrot.lane.b32.xlu0 %v714_v7, %s3155_s0  ;;  %716 = vrot.lane.b32.xlu1 %v714_v7, %s3158_s2  ;;  %v800_v28 = vrot.slane %v714_v7, 4 }
0x1379   :  { %v720_v10 = vpop.permute.xlu0 %719  ;;  %v3480_v12 = vpop.permute.xlu1 %716 }
0x137a   :  { %v722_v15 = vsel %vm100_vm0, %v3480_v12, %v720_v10 }
0x137b   :  { %v723_v17 = vmul.f32 %v3340_v5, %v722_v15 }
0x137d   :  { %v724_v18 = vpack.c.bf16 %v723_v17, %v723_v17 }
0x137f   :  { %2767 = vmatmul.mubr.msk.bf16.vlgmr.msra.gmra.mrb[20].mxu1 %vm246_vm8, %v724_v18  ;;  %v911_v18 = vadd.s32 8, %v3250_v13 }
0x1452   :  { %v762_v19 = vpop.f32.mrb[20].mxu1 }
0x1453   :  { %v768_v20 = vadd.f32 %v762_v19, %v3278_v50  ;;  %v2768_v59 = vpop.f32.mrb[21].mxu1  ;;  %v820_v50 = vrot.slane %v3386_v6, 4  ;;  %v912_v19 = vadd.s32 16, %v3250_v13 }
0x1454   :  { %v765_v21 = vpop.f32.mrb[22].mxu1  ;;  %v925_v59 = vand.u32 3, %v911_v18 }
0x1455   :  { %v2486_v22 = vmul.f32 -1.442695, %v768_v20  ;;  %v2769_v23 = vpop.f32.mrb[23].mxu1  ;;  %v932_v21 = vand.u32 3, %v912_v19 }
0x1456   :  { %v963_v23 = vadd.s32 2, %v925_v59 }
0x1457   :  { %3053 = vpow2.f32 %v2486_v22 }
0x1461   :  { %v3054_v24 = vpop.eup %3053 }
0x1462   :  { %v772_v61 = vadd.f32 1.0, %v3054_v24  ;;  %v964_v24 = vadd.s32 2, %v932_v21 }
0x1464   :  { %3055 = vrcp.f32 %v772_v61  ;;  %v918_v61 = vand.u32 3, %v3250_v13 }
0x146e   :  { %v3056_v25 = vpop.eup %3055 }
0x146f   :  { %v775_v26 = vmul.f32 2.0, %v3056_v25  ;;  %v777_v43 = vmul.f32 %v3056_v25, %v708_v44 }
0x1471   :  { %v2487_v62 = vadd.f32 -1.0, %v775_v26  ;;  %v977_v26 = vand.u32 3, %v963_v23 }
0x1473   :  { %779 = vrot.lane.b32.xlu1 %v2487_v62, %s3155_s0  ;;  %v984_v62 = vand.u32 3, %v964_v24  ;;  %vm995_vm11 = vcmp.ne.s32.totalorder %v977_v26, 0  ;;  %vm999_vm12 = vcmp.lt.s32.totalorder %v977_v26, 0 }
0x1474   :  { %vm1003_vm3 = vmand %vm999_vm12, %vm995_vm11 }
0x1475   :  { %vm996_vm13 = vcmp.ne.s32.totalorder %v984_v62, 0  ;;  %vm1000_vm14 = vcmp.lt.s32.totalorder %v984_v62, 0 }
0x1476   :  { %vm1004_vm4 = vmand %vm1000_vm14, %vm996_vm13 }
0x14e5   :  { %v780_v27 = vpop.permute.xlu1 %779 }
0x14e6   :  { %v782_v63 = vmul.f32 %v3056_v25, %v780_v27  ;;  %v962_v27 = vadd.s32 2, %v918_v61 }
0x14e8   :  { %784 = vrot.lane.b32.xlu0 %v782_v63, %s3158_s2 }
0x14ec   :  { %801 = vrot.lane.b32.xlu0 %v800_v28, %s3155_s0  ;;  %v1007_v28 = vadd.s32 4, %v977_v26 }
0x14f0   :  { %821 = vrot.lane.b32.xlu0 %v820_v50, %s3155_s0  ;;  %v1018_v50 = vand.u32 3, %v3333_v2 }
0x155a   :  { %v785_v29 = vpop.permute.xlu0 %784 }
0x155b   :  { %v787_v48 = vadd.f32 %v785_v29, %v777_v43  ;;  %v970_v43 = vand.u32 3, %v962_v27  ;;  %v1008_v29 = vadd.s32 4, %v984_v62 }
0x155d   :  { %3057 = vtanh.f32 %v787_v48  ;;  %vm3548_vm5 = vcmp.eq.s32.totalorder %v970_v43, %v1018_v50 }
0x155e   :  { %v802_v47 = vpop.permute.xlu0 %801 }
0x155f   :  { %v804_v52 = vsel %vm100_vm0, %v3366_v34, %v802_v47 }
0x1560   :  { %v839_v54 = vrot.slane %v804_v52, 4 }
0x1562   :  { %v822_v51 = vpop.permute.xlu0 %821 }
0x1567   :  { %v3058_v31 = vpop.eup %3057 }
0x1568   :  { %790 = vrot.lane.b32.xlu1 %v3058_v31, %s3155_s0  ;;  %v1011_v31 = vsel %vm1003_vm3, %v1007_v28, %v977_v26 }
0x1569   :  { %vm3556_vm7 = vcmp.eq.s32.totalorder %v1011_v31, %v1018_v50 }
0x156c   :  { %811 = vrot.lane.b32.xlu1 %v810_v38, %s3155_s0 }
0x1570   :  { %806 = vrot.lane.b32.xlu1 %v805_v39, %s3155_s0 }
0x15da   :  { %v791_v41 = vpop.permute.xlu1 %790 }
0x15db   :  { %v793_v42 = vmul.f32 %v3056_v25, %v791_v41  ;;  %v1012_v41 = vsel %vm1004_vm4, %v1008_v29, %v984_v62 }
0x15dd   :  { %v795_v6 = vrot.slane %v793_v42, 4  ;;  %830 = vrot.lane.b32.xlu1 %v793_v42, %s3158_s2 }
0x15de   :  { %v812_v30 = vpop.permute.xlu1 %811 }
0x15df   :  { %796 = vrot.lane.b32.xlu0 %v795_v6, %s3155_s0  ;;  %v814_v33 = vsel %vm100_vm0, %v3418_v37, %v812_v30  ;;  %v2938_v6 = vld [vmem:[%s4017_s4 + $0x10] ss:$8 sps:$4 sm:$0xff]  }
0x15e0   :  { %v842_v55 = vrot.slane %v814_v33, 4  ;;  %v2944_v30 = vld [vmem:[%s4017_s4 + $0x30] ss:$8 sps:$4 sm:$0xff]  }
0x15e1   :  { %816 = vrot.lane.b32.xlu1 %v815_v45, %s3155_s0  ;;  %v2943_v45 = vld [vmem:[%s4017_s4 + $0x24] ss:$8 sps:$4 sm:$0xff]  }
0x15e2   :  { %v807_v49 = vpop.permute.xlu1 %806 }
0x15e3   :  { %834 = vrot.lane.b32.xlu0 %v833_v46, %s3155_s0  ;;  %v809_v1 = vsel %vm100_vm0, %v3392_v8, %v807_v49  ;;  %v824_v8 = vsel %vm100_vm0, %v3468_v35, %v822_v51 }
0x15e4   :  { %v3514_v57 = vsel %vm160_vm1, %v809_v1, %v842_v55  ;;  %v845_v36 = vrot.slane %v824_v8, 4 }
0x15e7   :  { %826 = vrot.lane.b32.xlu0 %v825_v9, %s3155_s0 }
0x164f   :  { %v831_v53 = vpop.permute.xlu1 %830 }
0x1651   :  { %v797_v56 = vpop.permute.xlu0 %796 }
0x1652   :  { %v799_v32 = vsel %vm100_vm0, %v3337_v3, %v797_v56 }
0x1653   :  { %v3517_v58 = vsel %vm160_vm1, %v799_v32, %v839_v54  ;;  %v817_v37 = vpop.permute.xlu1 %816 }
0x1654   :  { %v854_v34 = vpack.c.bf16 %v3514_v57, %v3517_v58  ;;  %v819_v44 = vsel %vm100_vm0, %v3443_v11, %v817_v37 }
0x1655   :  { %v835_v40 = vpop.permute.xlu0 %834  ;;  %v3532_v10 = vsel %vm160_vm1, %v819_v44, %v845_v36 }
0x1656   :  { %v837_v60 = vsel %vm100_vm0, %v831_v53, %v835_v40  ;;  %2890 = vmatprep.subr.msk.bf16.mxu0 %vm246_vm8, %v854_v34  ;;  %2774 = vmatprep.mubr.msk.bf16.mxu0 %vm246_vm8, %v854_v34  ;;  %v857_v3 = vsel %vm246_vm8, %v854_v34, 0 }
0x1657   :  { %2778 = vmatprep.subr.bf16.mxu1 %v854_v34  ;;  %2771 = vmatpush3.bf16.xpose.msra.mxu0 %v857_v3  ;;  %v848_v0 = vrot.slane %v837_v60, 4 }
0x1658   :  { %2779 = vmatpush3.bf16.msra.mxu1 %v854_v34 }
0x1659   :  { %v827_v7 = vpop.permute.xlu0 %826 }
0x165a   :  { %v829_v35 = vsel %vm100_vm0, %v3480_v12, %v827_v7  ;;  %v913_v12 = vadd.s32 24, %v3250_v13 }
0x165b   :  { %v3535_v15 = vsel %vm160_vm1, %v829_v35, %v848_v0 }
0x165c   :  { %v855_v17 = vpack.c.bf16 %v3535_v15, %v3532_v10  ;;  %v939_v20 = vand.u32 3, %v913_v12 }
0x165e   :  { %2891 = vmatprep.subr.msk.bf16.mxu0 %vm246_vm8, %v855_v17  ;;  %2780 = vmatprep.subr.bf16.mxu1 %v855_v17  ;;  %v860_v11 = vsel %vm246_vm8, %v855_v17, 0  ;;  %v965_v22 = vadd.s32 2, %v939_v20 }
0x165f   :  { %2773 = vmatpush3.bf16.xpose.msra.mxu0 %v860_v11  ;;  %2781 = vmatpush3.bf16.msra.mxu1 %v855_v17 }
0x1660   :  { %2786 = vmatprep.subr.bf16.mxu1 %v3154_v4  ;;  %v991_v25 = vand.u32 3, %v965_v22 }
0x1662   :  { %vm997_vm9 = vcmp.ne.s32.totalorder %v991_v25, 0  ;;  %vm1001_vm10 = vcmp.lt.s32.totalorder %v991_v25, 0  ;;  %v1009_v63 = vadd.s32 4, %v991_v25 }
0x1663   :  { %vm1005_vm15 = vmand %vm1001_vm10, %vm997_vm9  ;;  %vm3562_vm9 = vcmp.eq.s32.totalorder %v1012_v41, %v1018_v50  ;;  %v2937_v41 = vld [vmem:[%s4017_s4 + $0x4] ss:$8 sps:$4 sm:$0xff]  }
0x1664   :  { %v1013_v48 = vsel %vm1005_vm15, %v1009_v63, %v991_v25  ;;  %1403 = vmatprep.subr.bf16.mxu0 %v2937_v41 }
0x1665   :  { %vm3552_vm6 = vcmp.eq.s32.totalorder %v1013_v48, %v1018_v50 }
0x1666   :  { %2775 = vmatmul.mubr.msk.bf16.vlgmr.msra.gmra.mrb[12].mxu0 %vm246_vm8, %v855_v17 }
0x1739   :  { %v2776_v39 = vpop.f32.mrb[12].mxu0 }
0x173a   :  { %v896_v42 = vpop.f32.mrb[13].mxu0  ;;  %v1032_v53 = vsel %vm3562_vm9, %v2776_v39, -1e+30  ;;  %v2935_v39 = vld [vmem:[%s4017_s4] ss:$8 sps:$4 sm:$0xff]  }
0x173b   :  { %v1030_v46 = vsel %vm3548_vm5, %v896_v42, -1e+30  ;;  %v2777_v9 = vpop.f32.mrb[14].mxu0  ;;  %v1040_v54 = vsel %vm100_vm0, %v1032_v53, -inf  ;;  %v2940_v42 = vld [vmem:[%s4017_s4 + $0x14] ss:$8 sps:$4 sm:$0xff]   ;;  %1404 = vmatpush1.bf16.msra.mxu0 %v2935_v39 }
0x173c   :  { %v899_v47 = vpop.f32.mrb[15].mxu0  ;;  %v1034_v49 = vsel %vm100_vm0, %v1030_v46, -inf  ;;  %v1033_v51 = vsel %vm3552_vm6, %v2777_v9, -1e+30  ;;  %1405 = vmatprep.subr.bf16.mxu0 %v2940_v42  ;;  %v2946_v9 = vld [vmem:[%s4017_s4 + $0x34] ss:$8 sps:$4 sm:$0xff]  }
0x173d   :  { %v1031_v52 = vsel %vm3556_vm7, %v899_v47, -1e+30  ;;  %1035 = vmax.xlane.f32.xlu1 %v1034_v49  ;;  %v1043_v1 = vsel %vm100_vm0, %v1033_v51, -inf  ;;  %v2949_v47 = vld [vmem:[%s4017_s4 + $0x44] ss:$8 sps:$4 sm:$0xff]  }
0x173e   :  { %v1037_v33 = vsel %vm100_vm0, %v1031_v52, -inf  ;;  %v2947_v49 = vld [vmem:[%s4017_s4 + $0x40] ss:$8 sps:$4 sm:$0xff]  }
0x173f   :  { %1038 = vmax.xlane.f32.xlu0 %v1037_v33  ;;  %1406 = vmatpush1.bf16.msra.mxu0 %v2938_v6  ;;  %v2955_v33 = vld [vmem:[%s4017_s4 + $0x64] ss:$8 sps:$4 sm:$0xff]  }
0x1740   :  { %1407 = vmatprep.subr.bf16.mxu0 %v2943_v45 }
0x1741   :  { %1044 = vmax.xlane.f32.xlu1 %v1043_v1  ;;  %v2958_v1 = vld [vmem:[%s4017_s4 + $0x74] ss:$8 sps:$4 sm:$0xff]  }
0x1743   :  { %1041 = vmax.xlane.f32.xlu0 %v1040_v54  ;;  %v2956_v54 = vld [vmem:[%s4017_s4 + $0x70] ss:$8 sps:$4 sm:$0xff]  }
0x17ca   :  { %v1036_v55 = vpop.xlane.xlu1 %1035 }
0x17cb   :  { %v1046_v56 = vsub.f32 %v1030_v46, %v1036_v55  ;;  %v2941_v46 = vld [vmem:[%s4017_s4 + $0x20] ss:$8 sps:$4 sm:$0xff]   ;;  %v2961_v55 = vld [vmem:[%s4017_s4 + $0x84] ss:$8 sps:$4 sm:$0xff]  }
0x17cc   :  { %v1039_v32 = vpop.xlane.xlu0 %1038  ;;  %1408 = vmatpush1.bf16.msra.mxu0 %v2941_v46 }
0x17cd   :  { %v1050_v34 = vmul.f32 1.442695, %v1046_v56  ;;  %v1047_v37 = vsub.f32 %v1031_v52, %v1039_v32  ;;  %1409 = vmatprep.subr.bf16.mxu0 %v2946_v9  ;;  %v2950_v52 = vld [vmem:[%s4017_s4 + $0x50] ss:$8 sps:$4 sm:$0xff]   ;;  %v2959_v56 = vld [vmem:[%s4017_s4 + $0x80] ss:$8 sps:$4 sm:$0xff]  }
0x17ce   :  { %v1045_v40 = vpop.xlane.xlu1 %1044  ;;  %v2964_v32 = vld [vmem:[%s4017_s4 + $0x94] ss:$8 sps:$4 sm:$0xff]  }
0x17cf   :  { %3059 = vpow2.f32 %v1050_v34  ;;  %v1052_v8 = vmul.f32 1.442695, %v1047_v37  ;;  %v1049_v60 = vsub.f32 %v1033_v51, %v1045_v40  ;;  %v2952_v51 = vld [vmem:[%s4017_s4 + $0x54] ss:$8 sps:$4 sm:$0xff]   ;;  %v2962_v34 = vld [vmem:[%s4017_s4 + $0x90] ss:$8 sps:$4 sm:$0xff]  }
0x17d0   :  { %v1042_v3 = vpop.xlane.xlu0 %1041  ;;  %1410 = vmatpush1.bf16.msra.mxu0 %v2944_v30  ;;  %v2967_v37 = vld [vmem:[%s4017_s4 + $0xa4] ss:$8 sps:$4 sm:$0xff]   ;;  %v2965_v40 = vld [vmem:[%s4017_s4 + $0xa0] ss:$8 sps:$4 sm:$0xff]  }
0x17d1   :  { %3061 = vpow2.f32 %v1052_v8  ;;  %v1056_v44 = vmul.f32 1.442695, %v1049_v60  ;;  %v1048_v36 = vsub.f32 %v1032_v53, %v1042_v3  ;;  %1411 = vmatprep.subr.bf16.mxu0 %v2949_v47  ;;  %v2953_v53 = vld [vmem:[%s4017_s4 + $0x60] ss:$8 sps:$4 sm:$0xff]   ;;  %v2970_v8 = vld [vmem:[%s4017_s4 + $0xb4] ss:$8 sps:$4 sm:$0xff]  }
0x17d2   :  { %v2968_v60 = vld [vmem:[%s4017_s4 + $0xb0] ss:$8 sps:$4 sm:$0xff]   ;;  %v2973_v3 = vld [vmem:[%s4017_s4 + $0xc4] ss:$8 sps:$4 sm:$0xff]  }
0x17d3   :  { %3063 = vpow2.f32 %v1056_v44  ;;  %v1054_v0 = vmul.f32 1.442695, %v1048_v36  ;;  %v2971_v44 = vld [vmem:[%s4017_s4 + $0xc0] ss:$8 sps:$4 sm:$0xff]   ;;  %v2976_v36 = vld [vmem:[%s4017_s4 + $0xd4] ss:$8 sps:$4 sm:$0xff]  }
0x17d4   :  { %1412 = vmatpush1.bf16.msra.mxu0 %v2947_v49 }
0x17d5   :  { %3065 = vpow2.f32 %v1054_v0  ;;  %1413 = vmatprep.subr.bf16.mxu0 %v2952_v51  ;;  %v2974_v0 = vld [vmem:[%s4017_s4 + $0xd0] ss:$8 sps:$4 sm:$0xff]  }
0x17d8   :  { %1414 = vmatpush1.bf16.msra.mxu0 %v2950_v52 }
0x17d9   :  { %v3060_v7 = vpop.eup %3059  ;;  %1415 = vmatprep.subr.bf16.mxu0 %v2955_v33 }
0x17da   :  { %v1058_v35 = vsel %vm3548_vm5, %v3060_v7, 0.0  ;;  %v2979_v7 = vld [vmem:[%s4017_s4 + $0xe4] ss:$8 sps:$4 sm:$0xff]  }
0x17db   :  { %v3062_v17 = vpop.eup %3061  ;;  %v1062_v11 = vsel %vm100_vm0, %v1058_v35, 0.0 }
0x17dc   :  { %1063 = vadd.xlane.f32.xlu0 %v1062_v11  ;;  %v1059_v12 = vsel %vm3556_vm7, %v3062_v17, 0.0  ;;  %1416 = vmatpush1.bf16.msra.mxu0 %v2953_v53  ;;  %v2982_v17 = vld [vmem:[%s4017_s4 + $0xf4] ss:$8 sps:$4 sm:$0xff]   ;;  %v2980_v11 = vld [vmem:[%s4017_s4 + $0xf0] ss:$8 sps:$4 sm:$0xff]  }
0x17dd   :  { %v3064_v18 = vpop.eup %3063  ;;  %v1065_v19 = vsel %vm100_vm0, %v1059_v12, 0.0  ;;  %1417 = vmatprep.subr.bf16.mxu0 %v2958_v1 }
0x17de   :  { %1066 = vadd.xlane.f32.xlu1 %v1065_v19  ;;  %v1061_v20 = vsel %vm3552_vm6, %v3064_v18, 0.0 }
0x17df   :  { %v3066_v59 = vpop.eup %3065  ;;  %v1071_v22 = vsel %vm100_vm0, %v1061_v20, 0.0 }
0x17e0   :  { %v1060_v21 = vsel %vm3562_vm9, %v3066_v59, 0.0  ;;  %1418 = vmatpush1.bf16.msra.mxu0 %v2956_v54 }
0x17e1   :  { %v1068_v23 = vsel %vm100_vm0, %v1060_v21, 0.0  ;;  %1419 = vmatprep.subr.bf16.mxu0 %v2961_v55  ;;  %v1227_v55 = vld [vmem:[%s4019_s6] sm:$0x3] }
0x17e2   :  { %1072 = vadd.xlane.f32.xlu1 %v1071_v22  ;;  %1069 = vadd.xlane.f32.xlu0 %v1068_v23 }
0x17e4   :  { %1420 = vmatpush1.bf16.msra.mxu0 %v2959_v56  ;;  %v1240_v56 = vrot.slane %v1227_v55, %v76_v14 }
0x17e5   :  { %1421 = vmatprep.subr.bf16.mxu0 %v2964_v32 }
0x17e8   :  { %1422 = vmatpush1.bf16.msra.mxu0 %v2962_v34  ;;  %v1236_v34 = vrot.slane %v1227_v55, %v72_v16 }
0x17e9   :  { %1423 = vmatprep.subr.bf16.mxu0 %v2967_v37 }
0x17ec   :  { %1424 = vmatpush1.bf16.msra.mxu0 %v2965_v40 }
0x17ed   :  { %1425 = vmatprep.subr.bf16.mxu0 %v2970_v8 }
0x17f0   :  { %1426 = vmatpush1.bf16.msra.mxu0 %v2968_v60 }
0x17f1   :  { %1427 = vmatprep.subr.bf16.mxu0 %v2973_v3 }
0x17f4   :  { %1428 = vmatpush1.bf16.msra.mxu0 %v2971_v44 }
0x17f5   :  { %1429 = vmatprep.subr.bf16.mxu0 %v2976_v36 }
0x17f8   :  { %1430 = vmatpush1.bf16.msra.mxu0 %v2974_v0 }
0x17f9   :  { %1431 = vmatprep.subr.bf16.mxu0 %v2979_v7 }
0x1869   :  { %v1064_v24 = vpop.xlane.xlu0 %1063 }
0x186a   :  { %3067 = vrcp.f32 %v1064_v24 }
0x186b   :  { %v1067_v61 = vpop.xlane.xlu1 %1066 }
0x186c   :  { %3069 = vrcp.f32 %v1067_v61 }
0x186f   :  { %v1073_v25 = vpop.xlane.xlu1 %1072  ;;  %v1070_v26 = vpop.xlane.xlu0 %1069 }
0x1870   :  { %3071 = vrcp.f32 %v1073_v25 }
0x1871   :  { %3073 = vrcp.f32 %v1070_v26 }
0x1874   :  { %v3068_v62 = vpop.eup %3067 }
0x1875   :  { %v1075_v63 = vmul.f32 %v3068_v62, %v1058_v35  ;;  %v2977_v35 = vld [vmem:[%s4017_s4 + $0xe0] ss:$8 sps:$4 sm:$0xff]  }
0x1876   :  { %v3070_v27 = vpop.eup %3069  ;;  %1432 = vmatpush1.bf16.msra.mxu0 %v2977_v35 }
0x1877   :  { %v1077_v28 = vmul.f32 %v3070_v27, %v1059_v12  ;;  %1433 = vmatprep.subr.bf16.mxu0 %v2982_v17 }
0x1879   :  { %v1082_v50 = vpack.c.bf16 %v1077_v28, %v1075_v63 }
0x187a   :  { %v3072_v43 = vpop.eup %3071  ;;  %1434 = vmatpush1.bf16.msra.mxu0 %v2980_v11 }
0x187b   :  { %v3074_v29 = vpop.eup %3073  ;;  %v1081_v48 = vmul.f32 %v3072_v43, %v1061_v20  ;;  %2782 = vmatprep.mubr.msk.bf16.mxu1 %vm100_vm0, %v1082_v50  ;;  %2834 = vmatprep.subr.bf16.mxu0 %v3154_v4 }
0x187c   :  { %v1079_v31 = vmul.f32 %v3074_v29, %v1060_v21 }
0x187e   :  { %v1083_v38 = vpack.c.bf16 %v1081_v48, %v1079_v31 }
0x1880   :  { %2783 = vmatmul.mubr.msk.bf16.vlgmr.msra.gmra.mrb[24].mxu1 %vm100_vm0, %v1083_v38 }
0x1881   :  { %2794 = vmatprep.mubr.msk.bf16.mxu1 %vm3157_vm2, %v3154_v4 }
0x1953   :  { %v2784_v12 = vpop.f32.mrb[24].mxu1 }
0x1954   :  { %v1124_v18 = vpop.f32.mrb[25].mxu1  ;;  %v1145_v20 = vmul.f32 %v2784_v12, %v3532_v10  ;;  %v1141_v31 = vsub.f32 %v3532_v10, %v2784_v12 }
0x1955   :  { %v2785_v19 = vpop.f32.mrb[26].mxu1  ;;  %v1143_v23 = vmul.f32 %v1124_v18, %v3517_v58  ;;  %v1139_v50 = vsub.f32 %v3517_v58, %v1124_v18 }
0x1956   :  { %v2915_v59 = vpack.i.bf16 %v2785_v19, %v2784_v12  ;;  %v1146_v21 = vmul.f32 %v2785_v19, %v3535_v15  ;;  %v1127_v22 = vpop.f32.mrb[27].mxu1  ;;  %v1142_v38 = vsub.f32 %v3535_v15, %v2785_v19 }
0x1957   :  { %v2905_v24 = vpack.i.bf16 %v1127_v22, %v1124_v18  ;;  %v1144_v61 = vmul.f32 %v1127_v22, %v3514_v57  ;;  %v1140_v43 = vsub.f32 %v3514_v57, %v1127_v22 }
0x1958   :  { %v2910_v25 = vpack.i.bf16 %v1146_v21, %v1145_v20 }
0x1959   :  { %2906 = vrot.lane.b32.xlu1 %v2905_v24, %s3155_s0  ;;  %v2900_v26 = vpack.i.bf16 %v1144_v61, %v1143_v23 }
0x195b   :  { %2901 = vrot.lane.b32.xlu0 %v2900_v26, %s3155_s0 }
0x195d   :  { %2911 = vrot.lane.b32.xlu1 %v2910_v25, %s3155_s0 }
0x195f   :  { %2916 = vrot.lane.b32.xlu0 %v2915_v59, %s3155_s0 }
0x19cb   :  { %v2907_v62 = vpop.permute.xlu1 %2906 }
0x19cc   :  { %v2909_v27 = vunpack.i.h.bf16 %v2907_v62  ;;  %v2908_v63 = vunpack.i.l.bf16 %v2907_v62 }
0x19cd   :  { %v2902_v28 = vpop.permute.xlu0 %2901 }
0x19ce   :  { %v2904_v29 = vunpack.i.h.bf16 %v2902_v28  ;;  %v2903_v48 = vunpack.i.l.bf16 %v2902_v28  ;;  %v1180_v39 = vsel %vm246_vm8, %v3514_v57, %v2909_v27  ;;  %v1179_v41 = vsel %vm246_vm8, %v3517_v58, %v2908_v63 }
0x19cf   :  { %v2912_v42 = vpop.permute.xlu1 %2911  ;;  %v1228_v49 = vpack.c.bf16 %v1180_v39, %v1179_v41  ;;  %v3746_v39 = vld [vmem:[%s4018_s5] sm:$0xff]   ;;  %v3752_v41 = vld [vmem:[%s4018_s5 + $0x8] sm:$0xff]  }
0x19d0   :  { %v2914_v6 = vunpack.i.h.bf16 %v2912_v42  ;;  %v2913_v45 = vunpack.i.l.bf16 %v2912_v42  ;;  %v1183_v46 = vsel %vm246_vm8, %v1139_v50, %v2903_v48  ;;  %v1184_v9 = vsel %vm246_vm8, %v1140_v43, %v2904_v29  ;;  %2787 = vmatpush3.bf16.msra.mxu1 %v3746_v39 }
0x19d1   :  { %v2917_v30 = vpop.permute.xlu0 %2916  ;;  %v1229_v47 = vpack.c.bf16 %v1184_v9, %v1183_v46  ;;  %2788 = vmatprep.subr.bf16.mxu1 %v3154_v4 }
0x19d2   :  { %v1185_v51 = vsel %vm246_vm8, %v1141_v31, %v2913_v45  ;;  %v1186_v52 = vsel %vm246_vm8, %v1142_v38, %v2914_v6  ;;  %v2919_v33 = vunpack.i.h.bf16 %v2917_v30  ;;  %v2918_v53 = vunpack.i.l.bf16 %v2917_v30  ;;  %v3761_v6 = vld [vmem:[%s4018_s5 + $0x10] sm:$0xff]   ;;  %v3774_v45 = vld [vmem:[%s4018_s5 + $0x18] sm:$0xff]  }
0x19d3   :  { %1435 = vmatprep.mubr.bf16.mxu0 %v1229_v47  ;;  %v1231_v57 = vpack.c.bf16 %v1186_v52, %v1185_v51 }
0x19d4   :  { %1436 = vmatmul.mubr.bf16.vlgmr.msra.gmra.mrb[16].mxu0 %v1228_v49  ;;  %v1181_v58 = vsel %vm246_vm8, %v3532_v10, %v2918_v53  ;;  %v1182_v1 = vsel %vm246_vm8, %v3535_v15, %v2919_v33  ;;  %2789 = vmatpush3.bf16.msra.mxu1 %v3752_v41 }
0x19d5   :  { %1445 = vmatprep.mubr.bf16.mxu0 %v1231_v57  ;;  %v1230_v54 = vpack.c.bf16 %v1182_v1, %v1181_v58  ;;  %2835 = vmatpush3.bf16.msra.mxu0 %v3746_v39 }
0x19d6   :  { %2836 = vmatprep.subr.bf16.mxu0 %v3154_v4  ;;  %2790 = vmatprep.subr.bf16.mxu1 %v3154_v4 }
0x19d8   :  { %2791 = vmatpush3.bf16.msra.mxu1 %v3761_v6 }
0x19d9   :  { %2837 = vmatpush3.bf16.msra.mxu0 %v3752_v41  ;;  %2792 = vmatprep.subr.bf16.mxu1 %v3154_v4 }
0x19da   :  { %2838 = vmatprep.subr.bf16.mxu0 %v3154_v4 }
0x19dc   :  { %1446 = vmatmul.mubr.bf16.gmra.mrb[20].mxu0 %v1230_v54  ;;  %2793 = vmatpush3.bf16.msra.mxu1 %v3774_v45 }
0x19dd   :  { %2842 = vmatprep.mubr.msk.bf16.mxu0 %vm3157_vm2, %v3154_v4  ;;  %2839 = vmatpush3.bf16.msra.mxu0 %v3761_v6 }
0x19de   :  { %2840 = vmatprep.subr.bf16.mxu0 %v3154_v4  ;;  %2798 = vmatprep.subr.bf16.mxu1 %v3154_v4 }
0x19e1   :  { %2841 = vmatpush3.bf16.msra.mxu0 %v3774_v45 }
0x19e2   :  { %2858 = vmatprep.subr.bf16.mxu0 %v3154_v4 }
0x1aa7   :  { %v1437_v32 = vpop.f32.mrb[16].mxu0 }
0x1aa8   :  { %v1439_v10 = vpop.f32.mrb[17].mxu0  ;;  %v1438_v0 = vadd.f32 %v1437_v32, %v1236_v34 }
0x1aa9   :  { %v1440_v37 = vadd.f32 %v1439_v10, %v1240_v56  ;;  %v1441_v40 = vpop.f32.mrb[18].mxu0 }
0x1aaa   :  { %v1442_v15 = vadd.f32 %v1441_v40, %v1236_v34  ;;  %v1443_v8 = vpop.f32.mrb[19].mxu0  ;;  %v1458_v24 = vrot.slane %v1438_v0, 4 }
0x1aab   :  { %v1444_v60 = vadd.f32 %v1443_v8, %v1240_v56  ;;  %v1485_v59 = vrot.slane %v1440_v37, 4 }
0x1aac   :  { %v1466_v13 = vrot.slane %v1442_v15, 4 }
0x1aad   :  { %v1477_v17 = vrot.slane %v1444_v60, 4 }
0x1aaf   :  { %v1447_v3 = vpop.f32.mrb[20].mxu0 }
0x1ab0   :  { %v1448_v44 = vadd.f32 %v1447_v3, %v1236_v34  ;;  %v1449_v36 = vpop.f32.mrb[21].mxu0 }
0x1ab1   :  { %v1450_v7 = vadd.f32 %v1449_v36, %v1240_v56  ;;  %v1451_v35 = vpop.f32.mrb[22].mxu0 }
0x1ab2   :  { %v1474_v11 = vrot.slane %v1448_v44, 4  ;;  %v1452_v12 = vadd.f32 %v1451_v35, %v1236_v34  ;;  %v1453_v14 = vpop.f32.mrb[23].mxu0  ;;  %v3723_v18 = vsel %vm160_vm1, %v1448_v44, %v1444_v60 }
0x1ab3   :  { %v1469_v16 = vrot.slane %v1450_v7, 4  ;;  %v1454_v19 = vadd.f32 %v1453_v14, %v1240_v56  ;;  %v3726_v20 = vsel %vm160_vm1, %v1442_v15, %v1450_v7 }
0x1ab4   :  { %v1482_v21 = vrot.slane %v1452_v12, 4  ;;  %v3729_v22 = vsel %vm160_vm1, %v1474_v11, %v1477_v17  ;;  %v3732_v23 = vsel %vm160_vm1, %v1452_v12, %v1440_v37 }
0x1ab5   :  { %v1456_v61 = vsel %vm160_vm1, %v1438_v0, %v1454_v19  ;;  %v1461_v25 = vrot.slane %v1454_v19, 4  ;;  %v3736_v26 = vsel %vm160_vm1, %v1466_v13, %v1469_v16 }
0x1ab6   :  { %v2524_v62 = vmul.f32 -1.442695, %v1456_v61  ;;  %v3739_v27 = vsel %vm160_vm1, %v1482_v21, %v1485_v59 }
0x1ab7   :  { %v1463_v63 = vsel %vm160_vm1, %v1458_v24, %v1461_v25  ;;  %vm2426_vm1 = vcmask 1041408  }
0x1ab8   :  { %3075 = vpow2.f32 %v2524_v62 }
0x1ac2   :  { %v3076_v28 = vpop.eup %3075 }
0x1ac3   :  { %v1491_v50 = vadd.f32 1.0, %v3076_v28 }
0x1ac5   :  { %3077 = vrcp.f32 %v1491_v50 }
0x1acf   :  { %v3078_v43 = vpop.eup %3077 }
0x1ad0   :  { %v1494_v29 = vmul.f32 2.0, %v3078_v43 }
0x1ad2   :  { %v2525_v48 = vadd.f32 -1.0, %v1494_v29 }
0x1ad4   :  { %1497 = vrot.lane.b32.xlu1 %v2525_v48, %s3155_s0 }
0x1b46   :  { %v1498_v31 = vpop.permute.xlu1 %1497 }
0x1b47   :  { %v1500_v38 = vmul.f32 %v3078_v43, %v1498_v31 }
0x1b49   :  { %3079 = vtanh.f32 %v1500_v38 }
0x1b53   :  { %v3080_v42 = vpop.eup %3079 }
0x1b54   :  { %1503 = vrot.lane.b32.xlu0 %v3080_v42, %s3156_s18 }
0x1bc6   :  { %v1504_v46 = vpop.permute.xlu0 %1503 }
0x1bc7   :  { %v3780_v9 = vmul.f32 %v3078_v43, %v1504_v46 }
0x1bc9   :  { %1511 = vrot.lane.b32.xlu0 %v3780_v9, %s3155_s0  ;;  %1508 = vrot.lane.b32.xlu1 %v3780_v9, %s3158_s2 }
0x1bcd   :  { %1594 = vrot.lane.b32.xlu0 %v1500_v38, %s3158_s2 }
0x1c3b   :  { %v1512_v30 = vpop.permute.xlu0 %1511  ;;  %v1509_v47 = vpop.permute.xlu1 %1508 }
0x1c3c   :  { %v1514_v49 = vsel %vm100_vm0, %v1509_v47, %v1512_v30 }
0x1c3d   :  { %v1515_v51 = vmul.f32 %v3340_v5, %v1514_v49 }
0x1c3f   :  { %v1516_v52 = vpack.c.bf16 %v1515_v51, %v1515_v51  ;;  %v1595_v15 = vpop.permute.xlu0 %1594 }
0x1c41   :  { %2795 = vmatmul.mubr.msk.bf16.vlgmr.msra.gmra.mrb[28].mxu1 %vm246_vm8, %v1516_v52 }
0x1c42   :  { %2799 = vmatpush3.bf16.msra.mxu1 %v3746_v39  ;;  %2806 = vmatprep.mubr.msk.bf16.mxu1 %vm3157_vm2, %v3154_v4 }
0x1c43   :  { %2800 = vmatprep.subr.bf16.mxu1 %v3154_v4 }
0x1c46   :  { %2801 = vmatpush3.bf16.msra.mxu1 %v3752_v41 }
0x1c47   :  { %2802 = vmatprep.subr.bf16.mxu1 %v3154_v4 }
0x1c4a   :  { %2803 = vmatpush3.bf16.msra.mxu1 %v3761_v6 }
0x1c4b   :  { %2804 = vmatprep.subr.bf16.mxu1 %v3154_v4 }
0x1c4e   :  { %2805 = vmatpush3.bf16.msra.mxu1 %v3774_v45 }
0x1c4f   :  { %2810 = vmatprep.subr.bf16.mxu1 %v3154_v4 }
0x1d14   :  { %v1578_v33 = vpop.f32.mrb[28].mxu1 }
0x1d15   :  { %v1584_v53 = vadd.f32 %v1578_v33, %v1463_v63  ;;  %v2796_v57 = vpop.f32.mrb[29].mxu1 }
0x1d16   :  { %v1581_v58 = vpop.f32.mrb[30].mxu1 }
0x1d17   :  { %v2531_v1 = vmul.f32 -1.442695, %v1584_v53  ;;  %v2797_v54 = vpop.f32.mrb[31].mxu1 }
0x1d19   :  { %3081 = vpow2.f32 %v2531_v1 }
0x1d23   :  { %v3082_v55 = vpop.eup %3081 }
0x1d24   :  { %v1588_v56 = vadd.f32 1.0, %v3082_v55 }
0x1d26   :  { %3083 = vrcp.f32 %v1588_v56 }
0x1d30   :  { %v3084_v32 = vpop.eup %3083 }
0x1d31   :  { %v1591_v34 = vmul.f32 2.0, %v3084_v32  ;;  %v1597_v8 = vmul.f32 %v3084_v32, %v1595_v15 }
0x1d33   :  { %v2532_v10 = vadd.f32 -1.0, %v1591_v34 }
0x1d35   :  { %1599 = vrot.lane.b32.xlu1 %v2532_v10, %s3155_s0 }
0x1da7   :  { %v1600_v37 = vpop.permute.xlu1 %1599 }
0x1da8   :  { %v1602_v40 = vmul.f32 %v3084_v32, %v1600_v37 }
0x1daa   :  { %1604 = vrot.lane.b32.xlu1 %v1602_v40, %s3158_s2 }
0x1e1c   :  { %v1605_v60 = vpop.permute.xlu1 %1604 }
0x1e1d   :  { %v1607_v3 = vadd.f32 %v1605_v60, %v1597_v8 }
0x1e1f   :  { %3085 = vtanh.f32 %v1607_v3 }
0x1e29   :  { %v3086_v44 = vpop.eup %3085 }
0x1e2a   :  { %1610 = vrot.lane.b32.xlu0 %v3086_v44, %s3155_s0 }
0x1e9c   :  { %v1611_v36 = vpop.permute.xlu0 %1610 }
0x1e9d   :  { %v1613_v0 = vmul.f32 %v3084_v32, %v1611_v36 }
0x1e9f   :  { %1618 = vrot.lane.b32.xlu0 %v1613_v0, %s3155_s0  ;;  %1615 = vrot.lane.b32.xlu1 %v1613_v0, %s3158_s2  ;;  %v2088_v38 = vadd.f32 %v1613_v0, %v3780_v9  ;;  %v2089_v42 = vmax.f32 %v3780_v9, %v1613_v0 }
0x1f11   :  { %v1619_v7 = vpop.permute.xlu0 %1618  ;;  %v1616_v35 = vpop.permute.xlu1 %1615 }
0x1f12   :  { %v1621_v17 = vsel %vm100_vm0, %v1616_v35, %v1619_v7 }
0x1f13   :  { %v1622_v11 = vmul.f32 %v3340_v5, %v1621_v17 }
0x1f15   :  { %v1623_v12 = vpack.c.bf16 %v1622_v11, %v1622_v11 }
0x1f17   :  { %2807 = vmatmul.mubr.msk.bf16.vlgmr.msra.gmra.mrb[32].mxu1 %vm246_vm8, %v1623_v12 }
0x1f18   :  { %2811 = vmatpush3.bf16.msra.mxu1 %v3746_v39  ;;  %2818 = vmatprep.mubr.msk.bf16.mxu1 %vm3157_vm2, %v3154_v4 }
0x1f19   :  { %2812 = vmatprep.subr.bf16.mxu1 %v3154_v4 }
0x1f1c   :  { %2813 = vmatpush3.bf16.msra.mxu1 %v3752_v41 }
0x1f1d   :  { %2814 = vmatprep.subr.bf16.mxu1 %v3154_v4 }
0x1f20   :  { %2815 = vmatpush3.bf16.msra.mxu1 %v3761_v6 }
0x1f21   :  { %2816 = vmatprep.subr.bf16.mxu1 %v3154_v4 }
0x1f24   :  { %2817 = vmatpush3.bf16.msra.mxu1 %v3774_v45 }
0x1f25   :  { %2822 = vmatprep.subr.bf16.mxu1 %v3154_v4 }
0x1fea   :  { %v1661_v14 = vpop.f32.mrb[32].mxu1 }
0x1feb   :  { %v1667_v13 = vadd.f32 %v1661_v14, %v3726_v20  ;;  %v2808_v16 = vpop.f32.mrb[33].mxu1 }
0x1fec   :  { %v1664_v19 = vpop.f32.mrb[34].mxu1 }
0x1fed   :  { %v2534_v59 = vmul.f32 -1.442695, %v1667_v13  ;;  %v2809_v21 = vpop.f32.mrb[35].mxu1 }
0x1fef   :  { %3087 = vpow2.f32 %v2534_v59 }
0x1ff9   :  { %v3088_v24 = vpop.eup %3087 }
0x1ffa   :  { %v1671_v61 = vadd.f32 1.0, %v3088_v24 }
0x1ffc   :  { %3089 = vrcp.f32 %v1671_v61 }
0x2006   :  { %v3090_v25 = vpop.eup %3089 }
0x2007   :  { %v1674_v62 = vmul.f32 2.0, %v3090_v25  ;;  %v1676_v43 = vmul.f32 %v3090_v25, %v1607_v3 }
0x2009   :  { %v2535_v63 = vadd.f32 -1.0, %v1674_v62 }
0x200b   :  { %1678 = vrot.lane.b32.xlu1 %v2535_v63, %s3155_s0 }
0x207d   :  { %v1679_v28 = vpop.permute.xlu1 %1678 }
0x207e   :  { %v1681_v50 = vmul.f32 %v3090_v25, %v1679_v28 }
0x2080   :  { %1683 = vrot.lane.b32.xlu0 %v1681_v50, %s3158_s2 }
0x20f2   :  { %v1684_v29 = vpop.permute.xlu0 %1683 }
0x20f3   :  { %v1686_v20 = vadd.f32 %v1684_v29, %v1676_v43 }
0x20f5   :  { %3091 = vtanh.f32 %v1686_v20 }
0x20ff   :  { %v3092_v48 = vpop.eup %3091 }
0x2100   :  { %1689 = vrot.lane.b32.xlu1 %v3092_v48, %s3155_s0 }
0x2172   :  { %v1690_v31 = vpop.permute.xlu1 %1689 }
0x2173   :  { %v1692_v46 = vmul.f32 %v3090_v25, %v1690_v31 }
0x2175   :  { %v2090_v30 = vadd.f32 %v2088_v38, %v1692_v46  ;;  %v3824_v47 = vmax.f32 %v2089_v42, %v1692_v46  ;;  %1697 = vrot.lane.b32.xlu1 %v1692_v46, %s3155_s0  ;;  %1694 = vrot.lane.b32.xlu0 %v1692_v46, %s3158_s2 }
0x21e7   :  { %v1698_v49 = vpop.permute.xlu1 %1697  ;;  %v1695_v51 = vpop.permute.xlu0 %1694 }
0x21e8   :  { %v1700_v52 = vsel %vm100_vm0, %v1695_v51, %v1698_v49 }
0x21e9   :  { %v1701_v33 = vmul.f32 %v3340_v5, %v1700_v52 }
0x21eb   :  { %v1702_v53 = vpack.c.bf16 %v1701_v33, %v1701_v33 }
0x21ed   :  { %2819 = vmatmul.mubr.msk.bf16.vlgmr.msra.gmra.mrb[36].mxu1 %vm246_vm8, %v1702_v53 }
0x21ee   :  { %2823 = vmatpush3.bf16.msra.mxu1 %v3746_v39  ;;  %2830 = vmatprep.mubr.msk.bf16.mxu1 %vm3157_vm2, %v3154_v4 }
0x21ef   :  { %2824 = vmatprep.subr.bf16.mxu1 %v3154_v4 }
0x21f2   :  { %2825 = vmatpush3.bf16.msra.mxu1 %v3752_v41 }
0x21f3   :  { %2826 = vmatprep.subr.bf16.mxu1 %v3154_v4 }
0x21f6   :  { %2827 = vmatpush3.bf16.msra.mxu1 %v3761_v6 }
0x21f7   :  { %2828 = vmatprep.subr.bf16.mxu1 %v3154_v4 }
0x21fa   :  { %2829 = vmatpush3.bf16.msra.mxu1 %v3774_v45 }
0x21fb   :  { %2846 = vmatprep.subr.bf16.mxu1 %v3154_v4 }
0x22c0   :  { %v1740_v9 = vpop.f32.mrb[36].mxu1 }
0x22c1   :  { %v1746_v57 = vadd.f32 %v1740_v9, %v3736_v26  ;;  %v2820_v58 = vpop.f32.mrb[37].mxu1 }
0x22c2   :  { %v1743_v1 = vpop.f32.mrb[38].mxu1 }
0x22c3   :  { %v2537_v54 = vmul.f32 -1.442695, %v1746_v57  ;;  %v2821_v55 = vpop.f32.mrb[39].mxu1 }
0x22c5   :  { %3093 = vpow2.f32 %v2537_v54 }
0x22cf   :  { %v3094_v56 = vpop.eup %3093 }
0x22d0   :  { %v1750_v32 = vadd.f32 1.0, %v3094_v56 }
0x22d2   :  { %3095 = vrcp.f32 %v1750_v32 }
0x22dc   :  { %v3096_v34 = vpop.eup %3095 }
0x22dd   :  { %v1753_v10 = vmul.f32 2.0, %v3096_v34  ;;  %v1755_v8 = vmul.f32 %v3096_v34, %v1686_v20 }
0x22df   :  { %v2538_v37 = vadd.f32 -1.0, %v1753_v10 }
0x22e1   :  { %1757 = vrot.lane.b32.xlu0 %v2538_v37, %s3155_s0 }
0x2353   :  { %v1758_v40 = vpop.permute.xlu0 %1757 }
0x2354   :  { %v1760_v15 = vmul.f32 %v3096_v34, %v1758_v40 }
0x2356   :  { %1762 = vrot.lane.b32.xlu1 %v1760_v15, %s3158_s2 }
0x23c8   :  { %v1763_v60 = vpop.permute.xlu1 %1762 }
0x23c9   :  { %v1765_v26 = vadd.f32 %v1763_v60, %v1755_v8 }
0x23cb   :  { %3097 = vtanh.f32 %v1765_v26 }
0x23d5   :  { %v3098_v3 = vpop.eup %3097 }
0x23d6   :  { %1768 = vrot.lane.b32.xlu0 %v3098_v3, %s3155_s0 }
0x2448   :  { %v1769_v44 = vpop.permute.xlu0 %1768 }
0x2449   :  { %v1771_v36 = vmul.f32 %v3096_v34, %v1769_v44 }
0x244b   :  { %v2092_v0 = vadd.f32 %v2090_v30, %v1771_v36  ;;  %v2093_v7 = vmax.f32 %v3824_v47, %v1771_v36  ;;  %1776 = vrot.lane.b32.xlu0 %v1771_v36, %s3155_s0  ;;  %1773 = vrot.lane.b32.xlu1 %v1771_v36, %s3158_s2 }
0x24bd   :  { %v1777_v35 = vpop.permute.xlu0 %1776  ;;  %v1774_v17 = vpop.permute.xlu1 %1773 }
0x24be   :  { %v1779_v11 = vsel %vm100_vm0, %v1774_v17, %v1777_v35 }
0x24bf   :  { %v1780_v12 = vmul.f32 %v3340_v5, %v1779_v11 }
0x24c1   :  { %v1781_v14 = vpack.c.bf16 %v1780_v12, %v1780_v12 }
0x24c3   :  { %2831 = vmatmul.mubr.msk.bf16.vlgmr.msra.gmra.mrb[40].mxu1 %vm246_vm8, %v1781_v14 }
0x24c4   :  { %2847 = vmatpush3.bf16.msra.mxu1 %v3746_v39  ;;  %2854 = vmatprep.mubr.msk.bf16.mxu1 %vm3157_vm2, %v3154_v4 }
0x24c5   :  { %2848 = vmatprep.subr.bf16.mxu1 %v3154_v4 }
0x24c8   :  { %2849 = vmatpush3.bf16.msra.mxu1 %v3752_v41 }
0x24c9   :  { %2850 = vmatprep.subr.bf16.mxu1 %v3154_v4 }
0x24cc   :  { %2851 = vmatpush3.bf16.msra.mxu1 %v3761_v6 }
0x24cd   :  { %2852 = vmatprep.subr.bf16.mxu1 %v3154_v4 }
0x24d0   :  { %2853 = vmatpush3.bf16.msra.mxu1 %v3774_v45 }
0x2596   :  { %v1819_v13 = vpop.f32.mrb[40].mxu1 }
0x2597   :  { %v1825_v16 = vadd.f32 %v1819_v13, %v3723_v18  ;;  %v2832_v19 = vpop.f32.mrb[41].mxu1 }
0x2598   :  { %v1822_v59 = vpop.f32.mrb[42].mxu1 }
0x2599   :  { %v2540_v21 = vmul.f32 -1.442695, %v1825_v16  ;;  %v2833_v24 = vpop.f32.mrb[43].mxu1 }
0x259b   :  { %3099 = vpow2.f32 %v2540_v21 }
0x25a5   :  { %v3100_v61 = vpop.eup %3099 }
0x25a6   :  { %v1829_v25 = vadd.f32 1.0, %v3100_v61 }
0x25a8   :  { %3101 = vrcp.f32 %v1829_v25 }
0x25b2   :  { %v3102_v62 = vpop.eup %3101 }
0x25b3   :  { %v1832_v63 = vmul.f32 2.0, %v3102_v62  ;;  %v1834_v29 = vmul.f32 %v3102_v62, %v1765_v26 }
0x25b5   :  { %v2541_v28 = vadd.f32 -1.0, %v1832_v63 }
0x25b7   :  { %1836 = vrot.lane.b32.xlu1 %v2541_v28, %s3155_s0 }
0x2629   :  { %v1837_v50 = vpop.permute.xlu1 %1836 }
0x262a   :  { %v1839_v43 = vmul.f32 %v3102_v62, %v1837_v50 }
0x262c   :  { %1841 = vrot.lane.b32.xlu0 %v1839_v43, %s3158_s2 }
0x269e   :  { %v1842_v20 = vpop.permute.xlu0 %1841 }
0x269f   :  { %v1844_v18 = vadd.f32 %v1842_v20, %v1834_v29 }
0x26a1   :  { %3103 = vtanh.f32 %v1844_v18 }
0x26ab   :  { %v3104_v48 = vpop.eup %3103 }
0x26ac   :  { %1847 = vrot.lane.b32.xlu1 %v3104_v48, %s3155_s0 }
0x271e   :  { %v1848_v31 = vpop.permute.xlu1 %1847 }
0x271f   :  { %v1850_v38 = vmul.f32 %v3102_v62, %v1848_v31 }
0x2721   :  { %1855 = vrot.lane.b32.xlu1 %v1850_v38, %s3155_s0  ;;  %1852 = vrot.lane.b32.xlu0 %v1850_v38, %s3158_s2  ;;  %v2094_v42 = vadd.f32 %v2092_v0, %v1850_v38  ;;  %v3866_v46 = vmax.f32 %v2093_v7, %v1850_v38 }
0x2793   :  { %v1856_v30 = vpop.permute.xlu1 %1855  ;;  %v1853_v47 = vpop.permute.xlu0 %1852 }
0x2794   :  { %v1858_v49 = vsel %vm100_vm0, %v1853_v47, %v1856_v30 }
0x2795   :  { %v1859_v51 = vmul.f32 %v3340_v5, %v1858_v49 }
0x2797   :  { %v1860_v52 = vpack.c.bf16 %v1859_v51, %v1859_v51 }
0x2799   :  { %2843 = vmatmul.mubr.msk.bf16.vlgmr.msra.gmra.mrb[24].mxu0 %vm246_vm8, %v1860_v52 }
0x279a   :  { %2859 = vmatpush3.bf16.msra.mxu0 %v3746_v39  ;;  %2866 = vmatprep.mubr.msk.bf16.mxu0 %vm3157_vm2, %v3154_v4 }
0x279b   :  { %2860 = vmatprep.subr.bf16.mxu0 %v3154_v4 }
0x279e   :  { %2861 = vmatpush3.bf16.msra.mxu0 %v3752_v41 }
0x279f   :  { %2862 = vmatprep.subr.bf16.mxu0 %v3154_v4 }
0x27a2   :  { %2863 = vmatpush3.bf16.msra.mxu0 %v3761_v6 }
0x27a3   :  { %2864 = vmatprep.subr.bf16.mxu0 %v3154_v4 }
0x27a6   :  { %2865 = vmatpush3.bf16.msra.mxu0 %v3774_v45 }
0x27a7   :  { %2870 = vmatprep.subr.bf16.mxu0 %v3154_v4 }
0x286c   :  { %v1898_v33 = vpop.f32.mrb[24].mxu0 }
0x286d   :  { %v1904_v39 = vadd.f32 %v1898_v33, %v3729_v22  ;;  %v2844_v53 = vpop.f32.mrb[25].mxu0 }
0x286e   :  { %v1901_v9 = vpop.f32.mrb[26].mxu0 }
0x286f   :  { %v2543_v57 = vmul.f32 -1.442695, %v1904_v39  ;;  %v2845_v58 = vpop.f32.mrb[27].mxu0 }
0x2871   :  { %3105 = vpow2.f32 %v2543_v57 }
0x287b   :  { %v3106_v1 = vpop.eup %3105 }
0x287c   :  { %v1908_v41 = vadd.f32 1.0, %v3106_v1 }
0x287e   :  { %3107 = vrcp.f32 %v1908_v41  ;;  %v2987_v41 = vld [vmem:[%s4020_s7 + $0x40] sm:$0xff]  }
0x287f   :  { %2655 = vmatprep.subr.bf16.mxu1 %v2987_v41 }
0x2888   :  { %v3108_v54 = vpop.eup %3107 }
0x2889   :  { %v1911_v55 = vmul.f32 2.0, %v3108_v54  ;;  %v1913_v32 = vmul.f32 %v3108_v54, %v1844_v18 }
0x288b   :  { %v2544_v6 = vadd.f32 -1.0, %v1911_v55  ;;  %v2989_v55 = vld [vmem:[%s4020_s7 + $0x48] sm:$0xff]  }
0x288d   :  { %1915 = vrot.lane.b32.xlu0 %v2544_v6, %s3155_s0 }
0x28ff   :  { %v1916_v56 = vpop.permute.xlu0 %1915 }
0x2900   :  { %v1918_v45 = vmul.f32 %v3108_v54, %v1916_v56 }
0x2902   :  { %1920 = vrot.lane.b32.xlu1 %v1918_v45, %s3158_s2  ;;  %v2990_v45 = vld [vmem:[%s4020_s7 + $0x8] sm:$0xff]  }
0x2974   :  { %v1921_v34 = vpop.permute.xlu1 %1920 }
0x2975   :  { %v1923_v22 = vadd.f32 %v1921_v34, %v1913_v32 }
0x2977   :  { %3109 = vtanh.f32 %v1923_v22 }
0x2981   :  { %v3110_v10 = vpop.eup %3109 }
0x2982   :  { %1926 = vrot.lane.b32.xlu0 %v3110_v10, %s3155_s0 }
0x29f4   :  { %v1927_v37 = vpop.permute.xlu0 %1926 }
0x29f5   :  { %v1929_v40 = vmul.f32 %v3108_v54, %v1927_v37  ;;  %v2988_v54 = vld [vmem:[%s4020_s7] sm:$0xff]  }
0x29f7   :  { %1934 = vrot.lane.b32.xlu0 %v1929_v40, %s3155_s0  ;;  %1931 = vrot.lane.b32.xlu1 %v1929_v40, %s3158_s2  ;;  %v2096_v15 = vadd.f32 %v2094_v42, %v1929_v40  ;;  %v2097_v8 = vmax.f32 %v3866_v46, %v1929_v40  ;;  %v2992_v40 = vld [vmem:[%s4020_s7 + $0x10] sm:$0xff]  }
0x2a69   :  { %v1935_v60 = vpop.permute.xlu0 %1934  ;;  %v1932_v26 = vpop.permute.xlu1 %1931 }
0x2a6a   :  { %v1937_v3 = vsel %vm100_vm0, %v1932_v26, %v1935_v60  ;;  %v2994_v60 = vld [vmem:[%s4020_s7 + $0x18] sm:$0xff]   ;;  %v2995_v26 = vld [vmem:[%s4020_s7 + $0x60] sm:$0xff]  }
0x2a6b   :  { %v1938_v44 = vmul.f32 %v3340_v5, %v1937_v3  ;;  %v2996_v3 = vld [vmem:[%s4020_s7 + $0x20] sm:$0xff]  }
0x2a6d   :  { %v1939_v36 = vpack.c.bf16 %v1938_v44, %v1938_v44  ;;  %v2997_v44 = vld [vmem:[%s4020_s7 + $0x68] sm:$0xff]  }
0x2a6f   :  { %2855 = vmatmul.mubr.msk.bf16.vlgmr.msra.gmra.mrb[44].mxu1 %vm246_vm8, %v1939_v36  ;;  %v2998_v36 = vld [vmem:[%s4020_s7 + $0x28] sm:$0xff]  }
0x2a70   :  { %2656 = vmatpush3.bf16.msra.mxu1 %v2988_v54 }
0x2a71   :  { %2657 = vmatprep.subr.bf16.mxu1 %v2989_v55 }
0x2a74   :  { %2658 = vmatpush3.bf16.msra.mxu1 %v2990_v45 }
0x2b42   :  { %v1977_v0 = vpop.f32.mrb[44].mxu1 }
0x2b43   :  { %v1983_v7 = vadd.f32 %v1977_v0, %v3732_v23  ;;  %v2856_v35 = vpop.f32.mrb[45].mxu1  ;;  %v2999_v0 = vld [vmem:[%s4020_s7 + $0x70] sm:$0xff]  }
0x2b44   :  { %v1980_v17 = vpop.f32.mrb[46].mxu1  ;;  %v3001_v35 = vld [vmem:[%s4020_s7 + $0x78] sm:$0xff]  }
0x2b45   :  { %v2546_v11 = vmul.f32 -1.442695, %v1983_v7  ;;  %v2857_v12 = vpop.f32.mrb[47].mxu1  ;;  %v3000_v7 = vld [vmem:[%s4020_s7 + $0x30] sm:$0xff]   ;;  %v3002_v17 = vld [vmem:[%s4020_s7 + $0x38] sm:$0xff]  }
0x2b47   :  { %3111 = vpow2.f32 %v2546_v11  ;;  %v3003_v11 = vld [vmem:[%s4022_s9] sm:$0xff]  }
0x2b51   :  { %v3112_v14 = vpop.eup %3111 }
0x2b52   :  { %v1987_v13 = vadd.f32 1.0, %v3112_v14 }
0x2b54   :  { %3113 = vrcp.f32 %v1987_v13 }
0x2b5e   :  { %v3114_v16 = vpop.eup %3113 }
0x2b5f   :  { %v1990_v19 = vmul.f32 2.0, %v3114_v16  ;;  %v1992_v61 = vmul.f32 %v3114_v16, %v1923_v22  ;;  %v2991_v22 = vld [vmem:[%s4020_s7 + $0x50] sm:$0xff]  }
0x2b60   :  { %2659 = vmatprep.subr.bf16.mxu1 %v2991_v22 }
0x2b61   :  { %v2547_v59 = vadd.f32 -1.0, %v1990_v19  ;;  %2660 = vmatpush3.bf16.msra.mxu1 %v2992_v40 }
0x2b63   :  { %1994 = vrot.lane.b32.xlu1 %v2547_v59, %s3155_s0 }
0x2bd5   :  { %v1995_v21 = vpop.permute.xlu1 %1994 }
0x2bd6   :  { %v1997_v24 = vmul.f32 %v3114_v16, %v1995_v21  ;;  %v3005_v21 = vld [vmem:[%s4022_s9 + $0x10] sm:$0xff]  }
0x2bd8   :  { %1999 = vrot.lane.b32.xlu0 %v1997_v24, %s3158_s2 }
0x2c4a   :  { %v2000_v25 = vpop.permute.xlu0 %1999 }
0x2c4b   :  { %v2002_v23 = vadd.f32 %v2000_v25, %v1992_v61 }
0x2c4d   :  { %3115 = vtanh.f32 %v2002_v23 }
0x2c57   :  { %v3116_v62 = vpop.eup %3115 }
0x2c58   :  { %2005 = vrot.lane.b32.xlu1 %v3116_v62, %s3155_s0 }
0x2cca   :  { %v2006_v63 = vpop.permute.xlu1 %2005 }
0x2ccb   :  { %v2008_v28 = vmul.f32 %v3114_v16, %v2006_v63  ;;  %v3004_v16 = vld [vmem:[%s4022_s9 + $0x8] sm:$0xff]  }
0x2ccd   :  { %2013 = vrot.lane.b32.xlu1 %v2008_v28, %s3155_s0  ;;  %2010 = vrot.lane.b32.xlu0 %v2008_v28, %s3158_s2  ;;  %v2098_v50 = vadd.f32 %v2096_v15, %v2008_v28  ;;  %v2099_v43 = vmax.f32 %v2097_v8, %v2008_v28  ;;  %v2993_v15 = vld [vmem:[%s4020_s7 + $0x58] sm:$0xff]  }
0x2cce   :  { %2661 = vmatprep.subr.bf16.mxu1 %v2993_v15 }
0x2ccf   :  { %2662 = vmatpush3.bf16.msra.mxu1 %v2994_v60 }
0x2cd0   :  { %2663 = vmatprep.subr.bf16.mxu1 %v2995_v26 }
0x2cd3   :  { %2664 = vmatpush3.bf16.msra.mxu1 %v2996_v3 }
0x2cd4   :  { %2665 = vmatprep.subr.bf16.mxu1 %v2997_v44 }
0x2cd7   :  { %2666 = vmatpush3.bf16.msra.mxu1 %v2998_v36 }
0x2cd8   :  { %2667 = vmatprep.subr.bf16.mxu1 %v2999_v0 }
0x2cdb   :  { %2668 = vmatpush3.bf16.msra.mxu1 %v3000_v7 }
0x2cdc   :  { %2669 = vmatprep.subr.bf16.mxu1 %v3001_v35 }
0x2cdf   :  { %2670 = vmatpush3.bf16.msra.mxu1 %v3002_v17 }
0x2d3f   :  { %v2014_v29 = vpop.permute.xlu1 %2013  ;;  %v2011_v20 = vpop.permute.xlu0 %2010 }
0x2d40   :  { %v2016_v18 = vsel %vm100_vm0, %v2011_v20, %v2014_v29 }
0x2d41   :  { %v2017_v48 = vmul.f32 %v3340_v5, %v2016_v18  ;;  %v3006_v18 = vld [vmem:[%s4022_s9 + $0x18] sm:$0xff]  }
0x2d43   :  { %v2018_v31 = vpack.c.bf16 %v2017_v48, %v2017_v48  ;;  %v3007_v48 = vld [vmem:[%s4022_s9 + $0x20] sm:$0xff]  }
0x2d45   :  { %2867 = vmatmul.mubr.msk.bf16.vlgmr.msra.gmra.mrb[28].mxu0 %vm246_vm8, %v2018_v31  ;;  %v3008_v31 = vld [vmem:[%s4022_s9 + $0x28] sm:$0xff]  }
0x2d46   :  { %2886 = vmatprep.mubr.msk.bf16.mxu0 %vm3157_vm2, %v3154_v4  ;;  %2871 = vmatpush3.bf16.msra.mxu0 %v3003_v11 }
0x2d47   :  { %2872 = vmatprep.subr.bf16.mxu0 %v3154_v4 }
0x2d4a   :  { %2873 = vmatpush3.bf16.msra.mxu0 %v3004_v16 }
0x2d4b   :  { %2874 = vmatprep.subr.bf16.mxu0 %v3154_v4 }
0x2d4e   :  { %2875 = vmatpush3.bf16.msra.mxu0 %v3005_v21 }
0x2d4f   :  { %2876 = vmatprep.subr.bf16.mxu0 %v3154_v4 }
0x2d52   :  { %2877 = vmatpush3.bf16.msra.mxu0 %v3006_v18 }
0x2d53   :  { %2878 = vmatprep.subr.bf16.mxu0 %v3154_v4 }
0x2d56   :  { %2879 = vmatpush3.bf16.msra.mxu0 %v3007_v48 }
0x2d57   :  { %2880 = vmatprep.subr.bf16.mxu0 %v3154_v4 }
0x2d5a   :  { %2881 = vmatpush3.bf16.msra.mxu0 %v3008_v31 }
0x2d5b   :  { %2882 = vmatprep.subr.bf16.mxu0 %v3154_v4 }
0x2e18   :  { %v2056_v38 = vpop.f32.mrb[28].mxu0 }
0x2e19   :  { %v2062_v42 = vadd.f32 %v2056_v38, %v3739_v27  ;;  %v2868_v46 = vpop.f32.mrb[29].mxu0  ;;  %v3009_v38 = vld [vmem:[%s4022_s9 + $0x30] sm:$0xff]  }
0x2e1a   :  { %v2059_v30 = vpop.f32.mrb[30].mxu0  ;;  %2883 = vmatpush3.bf16.msra.mxu0 %v3009_v38 }
0x2e1b   :  { %v2549_v47 = vmul.f32 -1.442695, %v2062_v42  ;;  %v2869_v49 = vpop.f32.mrb[31].mxu0  ;;  %2884 = vmatprep.subr.bf16.mxu0 %v3154_v4  ;;  %v3010_v42 = vld [vmem:[%s4022_s9 + $0x38] sm:$0xff]   ;;  %v2551_v30 = vld [vmem:[%s4021_s8] ss:$0 sm:$0xff] }
0x2e1c   :  { %v2568_v4 = vld [vmem:[%s4023_s10] ss:$0 sm:$0xff]  ;;  %s3160_s8 = smov [#allocation2]  }
0x2e1d   :  { %3117 = vpow2.f32 %v2549_v47  ;;  %s2446_s9 = sshll.u32 %s3160_s8, 4  ;;  %s2447_s9 = int_to_ptr.vmem [resolvable:$true] %s2446_s9 }
0x2e1e   :  { %2885 = vmatpush3.bf16.msra.mxu0 %v3010_v42  ;;  %s3129_s10 = scalar_lea.vmem %s2447_s9, 32  ;;  %p3134_p1 = scmp.lt.s32.totalorder %s2447_s9, %s2447_s9 }
0x2e1f   :  { %p3130_p0 = scmp.ne.s32.totalorder %s2447_s9, %s3129_s10  ;;  %p3135_p2 = scmp.lt.s32.totalorder %s3129_s10, %s3129_s10 }
0x2e21   :  { %p3136_p3 = por %p3135_p2, %p3134_p1 }
0x2e23   :  { %p3137_p4 = pnand %p3136_p3, %p3130_p0 }
0x2e27   :  { %v3118_v51 = vpop.eup %3117 }
0x2e28   :  { %v2066_v52 = vadd.f32 1.0, %v3118_v51 }
0x2e2a   :  { %3119 = vrcp.f32 %v2066_v52 }
0x2e34   :  { %v3120_v33 = vpop.eup %3119 }
0x2e35   :  { %v2069_v39 = vmul.f32 2.0, %v3120_v33  ;;  %v2071_v57 = vmul.f32 %v3120_v33, %v2002_v23 }
0x2e37   :  { %v2550_v5 = vadd.f32 -1.0, %v2069_v39 }
0x2e39   :  { %2073 = vrot.lane.b32.xlu0 %v2550_v5, %s3155_s0 }
0x2eab   :  { %v2074_v53 = vpop.permute.xlu0 %2073 }
0x2eac   :  { %v2076_v9 = vmul.f32 %v3120_v33, %v2074_v53 }
0x2eae   :  { %2078 = vrot.lane.b32.xlu1 %v2076_v9, %s3158_s2 }
0x2f20   :  { %v2079_v58 = vpop.permute.xlu1 %2078 }
0x2f21   :  { %v2081_v27 = vadd.f32 %v2079_v58, %v2071_v57 }
0x2f23   :  { %3121 = vtanh.f32 %v2081_v27 }
0x2f2d   :  { %v3122_v1 = vpop.eup %3121 }
0x2f2e   :  { %2084 = vrot.lane.b32.xlu0 %v3122_v1, %s3155_s0 }
0x2fa0   :  { %v2085_v6 = vpop.permute.xlu0 %2084 }
0x2fa1   :  { %v2087_v56 = vmul.f32 %v3120_v33, %v2085_v6 }
0x2fa3   :  { %v2100_v32 = vadd.f32 %v2098_v50, %v2087_v56  ;;  %v2101_v34 = vmax.f32 %v2099_v43, %v2087_v56 }
0x2fa5   :  { %v2102_v10 = vmul.f32 0.125, %v2100_v32  ;;  %v2116_v37 = vrot.slane %v2101_v34, 4  ;;  %2113 = vrot.lane.b32.xlu1 %v2101_v34, %s3158_s2 }
0x2fa7   :  { %2117 = vrot.lane.b32.xlu0 %v2116_v37, %s3155_s0  ;;  %v2107_v8 = vrot.slane %v2102_v10, 4 }
0x2fa9   :  { %2104 = vrot.lane.b32.xlu1 %v2102_v10, %s3158_s2 }
0x2fab   :  { %2108 = vrot.lane.b32.xlu0 %v2107_v8, %s3155_s0 }
0x3017   :  { %v2114_v12 = vpop.permute.xlu1 %2113 }
0x3019   :  { %v2118_v14 = vpop.permute.xlu0 %2117 }
0x301a   :  { %v2120_v13 = vsel %vm100_vm0, %v2114_v12, %v2118_v14 }
0x301b   :  { %v2128_v19 = vrot.slane %v2120_v13, 2  ;;  %v2105_v61 = vpop.permute.xlu1 %2104 }
0x301d   :  { %v2920_v59 = vpack.i.bf16 %v2120_v13, %v2128_v19  ;;  %v2109_v24 = vpop.permute.xlu0 %2108 }
0x301e   :  { %v2111_v25 = vsel %vm100_vm0, %v2105_v61, %v2109_v24  ;;  %vm2424_vm0 = vcmp.lt.s32.totalorder %v3333_v2, 4 }
0x301f   :  { %2921 = vrot.lane.b32.xlu1 %v2920_v59, %s3155_s0  ;;  %v2126_v62 = vrot.slane %v2111_v25, 2 }
0x3091   :  { %v2922_v23 = vpop.permute.xlu1 %2921 }
0x3092   :  { %v2924_v63 = vunpack.i.h.bf16 %v2922_v23  ;;  %v2923_v28 = vunpack.i.l.bf16 %v2922_v23 }
0x3094   :  { %v2132_v50 = vsel %vm246_vm8, %v2111_v25, %v2924_v63  ;;  %v2133_v43 = vsel %vm246_vm8, %v2126_v62, %v2923_v28 }
0x3095   :  { %v2134_v29 = vpack.c.bf16 %v2132_v50, %v2132_v50  ;;  %v2135_v20 = vpack.c.bf16 %v2133_v43, %v2133_v43 }
0x3097   :  { %2303 = vmatprep.mubr.bf16.mxu1 %v2135_v20 }
0x3098   :  { %2304 = vmatmul.mubr.bf16.vlgmr.msra.gmra.mrb[48].mxu1 %v2134_v29 }
0x316b   :  { %v2671_v46 = vpop.f32.mrb[48].mxu1 }
0x316c   :  { %v2672_v47 = vpop.f32.mrb[49].mxu1 }
0x316d   :  { %v2673_v49 = vadd.f32 %v2672_v47, %v2671_v46  ;;  %v2674_v51 = vpop.f32.mrb[50].mxu1 }
0x316e   :  { %v2675_v52 = vpop.f32.mrb[51].mxu1 }
0x316f   :  { %v2306_v33 = vadd.f32 %v2673_v49, %v2551_v30 }
0x3171   :  { %3123 = vtanh.f32 %v2306_v33 }
0x317b   :  { %v3124_v39 = vpop.eup %3123 }
0x317c   :  { %v2312_v5 = vpack.c.bf16 %v3124_v39, %v3124_v39 }
0x317e   :  { %2887 = vmatmul.mubr.bf16.vlgmr.msra.gmra.mrb[32].mxu0 %v2312_v5 }
0x3251   :  { %v2418_v53 = vpop.f32.mrb[32].mxu0 }
0x3252   :  { %v2419_v9 = vadd.f32 %v2568_v4, %v2418_v53  ;;  %v2888_v57 = vpop.f32.mrb[33].mxu0 }
0x3253   :  { %v2421_v58 = vpop.f32.mrb[34].mxu0 }
0x3254   :  { %v2425_v27 = vsel %vm2424_vm0, %v2419_v9, -1e+30  ;;  %v2889_v1 = vpop.f32.mrb[35].mxu0 }
0x3255   :  { %v2427_v41 = vsel %vm2426_vm1, %v2425_v27, -inf }
0x3256   :  { %2428 = vmax.xlane.f32.xlu0 %v2427_v41 }
0x32e3   :  { %v2429_v54 = vpop.xlane.xlu0 %2428 }
0x32e4   :  { %v2430_v55 = vsub.f32 %v2425_v27, %v2429_v54 }
0x32e6   :  { %v2431_v6 = vmul.f32 1.442695, %v2430_v55 }
0x32e8   :  { %3125 = vpow2.f32 %v2431_v6 }
0x32f2   :  { %v3126_v56 = vpop.eup %3125 }
0x32f3   :  { %v2433_v45 = vsel %vm2424_vm0, %v3126_v56, 0.0 }
0x32f4   :  { %v2434_v32 = vsel %vm2426_vm1, %v2433_v45, 0.0 }
0x32f5   :  { %2435 = vadd.xlane.f32.xlu1 %v2434_v32 }
0x3382   :  { %v2436_v34 = vpop.xlane.xlu1 %2435 }
0x3383   :  { %3127 = vrcp.f32 %v2436_v34 }
0x338d   :  { %v3128_v2 = vpop.eup %3127 }
0x338e   :  { %v2438_v22 = vmul.f32 %v3128_v2, %v2433_v45 }
0x3390   :  { %2439 = vst [vmem:[#allocation2] sm:$0x3] %v2438_v22 }
0x3391   :  { %3140 = shalt.err (!%p3137_p4)
}
0x3392   :  { %s3141_s3 = scalar_lea.hbm %s4024_s11, 32 }
0x3393   :  { %p3142_p5 = scmp.ne.s32.totalorder %s4024_s11, %s3141_s3  ;;  %p3145_p6 = scmp.lt.u32.totalorder %s3141_s3, %s4024_s11 }
0x3395   :  { %p3147_p7 = pnand %p3145_p6, %p3142_p5 }
0x3397   :  { %3150 = shalt.err (!%p3147_p7)
}
0x3398   :  { %2449 = dma.vmem_to_hbm [thread:$0]  %s2447_s9, 32, %s4024_s11, [#allocation3]  }
0x3399   :  { %3151 = dma.done.wait [#allocation3], 32  }
0x339a   :  { %3152 = vsyncadd [#allocation3], 4294967264 }
0x339b   :  { %2453 = vsyncpa [#allocation3], 1 }

</bundles_post_ra>
